<compile_context>
chip_gen: v6e
topology: v6e:2x2x1
jax: 0.10.0
libtpu: 0.0.40
codegen_flags: <defaults>
</compile_context>

<pallas_src>
import numpy as np

import jax
import jax.numpy as jnp
from jax.experimental import pallas as pl
from jax.experimental.pallas import tpu as pltpu


# ------------------------------ fused kernel --------------------------------

def _cnn_small_kernel(x_ref, m1e_ref, m1o_ref, b1_ref, selh1_ref,
                      m2e_ref, m2o_ref, b2_ref, selh2_ref,
                      w3_ref, b3_ref, w4_ref, b4_ref, w5_ref, b5_ref,
                      out_ref):
    f32 = jnp.float32
    x = x_ref[0, 0]                                            # (32, 32)

    # ---- conv1 (1->6, 5x5 valid) -------------------------------------------
    # Banded form; the 2x2 pool's stride-2 column selection is folded into two
    # weight banks (even / odd output column).  rows = oh (28), lanes = pw*6+c.
    a_e = None
    a_o = None
    for kh in range(5):
        slab = x[kh:kh + 28, :]                                # (28, 32)
        te = jnp.dot(slab, m1e_ref[kh], preferred_element_type=f32)
        to = jnp.dot(slab, m1o_ref[kh], preferred_element_type=f32)
        a_e = te if a_e is None else a_e + te
        a_o = to if a_o is None else a_o + to
    # relu(conv + bias) then W-pool max; bias is parity-independent and relu
    # is monotone, so max may be taken first.
    h1 = jnp.maximum(jnp.maximum(a_e, a_o) + b1_ref[...], 0.0)  # (28, 84)

    # ---- pool1 over rows: constant 0/1 selection matmuls + VPU max ---------
    p1 = jnp.maximum(
        jnp.dot(selh1_ref[0], h1, preferred_element_type=f32),
        jnp.dot(selh1_ref[1], h1, preferred_element_type=f32))  # (14, 84)

    # ---- conv2 (6->16, 5x5 valid), banded; pool2 column selection folded ---
    a_e = None
    a_o = None
    for kh in range(5):
        slab = p1[kh:kh + 10, :]                               # (10, 84)
        te = jnp.dot(slab, m2e_ref[kh], preferred_element_type=f32)
        to = jnp.dot(slab, m2o_ref[kh], preferred_element_type=f32)
        a_e = te if a_e is None else a_e + te
        a_o = to if a_o is None else a_o + to
    h2 = jnp.maximum(jnp.maximum(a_e, a_o) + b2_ref[...], 0.0)  # (10, 80)

    # ---- pool2 over rows ----------------------------------------------------
    p2 = jnp.maximum(
        jnp.dot(selh2_ref[0], h2, preferred_element_type=f32),
        jnp.dot(selh2_ref[1], h2, preferred_element_type=f32))  # (5, 80)

    # ---- fc1: banded over the 5 pooled rows (folds NCHW .view(-1,400)) -----
    z = None
    for ph in range(5):
        t = jnp.dot(p2[ph:ph + 1, :], w3_ref[ph], preferred_element_type=f32)
        z = t if z is None else z + t
    z = jnp.maximum(z + b3_ref[...], 0.0)                      # (1, 120)

    # ---- fc2 / fc3 ----------------------------------------------------------
    z = jnp.maximum(jnp.dot(z, w4_ref[...], preferred_element_type=f32)
                    + b4_ref[...], 0.0)                        # (1, 84)
    z = jnp.dot(z, w5_ref[...], preferred_element_type=f32) + b5_ref[...]
    out_ref[0] = z.astype(out_ref.dtype)                       # (1, 128)


# ------------------------------ JAX wrapper ----------------------------------

def cnn_small_forward(prepped, x, *, num_classes=10):
    """x: (B, 1, 32, 32) f32 -> logits (B, num_classes)."""
    B = x.shape[0]

    def full_spec(a):
        return pl.BlockSpec(a.shape, lambda b: (0,) * a.ndim)

    operands = (x, prepped["m1e"], prepped["m1o"], prepped["b1"],
                prepped["selh1"], prepped["m2e"], prepped["m2o"], prepped["b2"],
                prepped["selh2"], prepped["w3"], prepped["b3"],
                prepped["w4"], prepped["b4"], prepped["w5"], prepped["b5"])

    in_specs = [pl.BlockSpec((1, 1, 32, 32), lambda b: (b, 0, 0, 0))]
    in_specs += [full_spec(a) for a in operands[1:]]

    out = pl.pallas_call(
        _cnn_small_kernel,
        grid=(B,),
        out_shape=jax.ShapeDtypeStruct((B, 1, 128), jnp.float32),
        in_specs=in_specs,
        out_specs=pl.BlockSpec((1, 1, 128), lambda b: (b, 0, 0)),
        compiler_params=pltpu.CompilerParams(
            dimension_semantics=("parallel",)),
    )(*operands)
    return out[:, 0, :num_classes]


# --------------------- parameter creation / one-time prep --------------------

def _uniform(key, shape, bound):
    return jax.random.uniform(key, shape, jnp.float32, -bound, bound)


def init_params(key, num_classes=10):
    """PyTorch-style default init (U(-1/sqrt(fan_in), 1/sqrt(fan_in)))."""
    ks = jax.random.split(key, 10)
    p = {}
    p["conv1_w"] = _uniform(ks[0], (6, 1, 5, 5), 1.0 / (25 ** 0.5))
    p["conv1_b"] = _uniform(ks[1], (6,), 1.0 / (25 ** 0.5))
    p["conv2_w"] = _uniform(ks[2], (16, 6, 5, 5), 1.0 / (150 ** 0.5))
    p["conv2_b"] = _uniform(ks[3], (16,), 1.0 / (150 ** 0.5))
    p["fc1_w"] = _uniform(ks[4], (120, 400), 1.0 / (400 ** 0.5))
    p["fc1_b"] = _uniform(ks[5], (120,), 1.0 / (400 ** 0.5))
    p["fc2_w"] = _uniform(ks[6], (84, 120), 1.0 / (120 ** 0.5))
    p["fc2_b"] = _uniform(ks[7], (84,), 1.0 / (120 ** 0.5))
    p["fc3_w"] = _uniform(ks[8], (num_classes, 84), 1.0 / (84 ** 0.5))
    p["fc3_b"] = _uniform(ks[9], (num_classes,), 1.0 / (84 ** 0.5))
    return p


def prepare_params(p, num_classes=10):
    """One-time repack of PyTorch-layout params into banded kernel operands."""
    w1 = np.asarray(p["conv1_w"], np.float32)      # (6, 1, 5, 5)
    b1 = np.asarray(p["conv1_b"], np.float32)
    w2 = np.asarray(p["conv2_w"], np.float32)      # (16, 6, 5, 5)
    b2 = np.asarray(p["conv2_b"], np.float32)
    f1 = np.asarray(p["fc1_w"], np.float32)        # (120, 400)
    f2 = np.asarray(p["fc2_w"], np.float32)        # (84, 120)
    f3 = np.asarray(p["fc3_w"], np.float32)        # (nc, 84)

    # conv1 banded weights with the 2x2 pool column selection folded in:
    #   m1e[kh, iw, pw*6+co] = w1[co,0,kh, iw-2*pw]      (output column 2*pw)
    #   m1o[kh, iw, pw*6+co] = w1[co,0,kh, iw-(2*pw+1)]  (output column 2*pw+1)
    m1e = np.zeros((5, 32, 14 * 6), np.float32)
    m1o = np.zeros((5, 32, 14 * 6), np.float32)
    for kh in range(5):
        for kw in range(5):
            for pw in range(14):
                m1e[kh, 2 * pw + kw, pw * 6:(pw + 1) * 6] = w1[:, 0, kh, kw]
                m1o[kh, 2 * pw + 1 + kw, pw * 6:(pw + 1) * 6] = w1[:, 0, kh, kw]
    b1t = np.tile(b1, 14).reshape(1, 84)

    # Row (H) pooling 0/1 selection matrices (even rows / odd rows).
    selh1 = np.zeros((2, 14, 28), np.float32)
    for r in range(14):
        selh1[0, r, 2 * r] = 1.0
        selh1[1, r, 2 * r + 1] = 1.0
    selh2 = np.zeros((2, 5, 10), np.float32)
    for r in range(5):
        selh2[0, r, 2 * r] = 1.0
        selh2[1, r, 2 * r + 1] = 1.0

    # conv2 banded weights: kw and cin contraction folded into the band,
    # pool2's column selection folded into even/odd variants.
    #   m2e[kh, (2*pw2+kw)*6+ci, pw2*16+co]   = w2[co, ci, kh, kw]
    #   m2o[kh, (2*pw2+1+kw)*6+ci, pw2*16+co] = w2[co, ci, kh, kw]
    m2e = np.zeros((5, 84, 5 * 16), np.float32)
    m2o = np.zeros((5, 84, 5 * 16), np.float32)
    for kh in range(5):
        for kw in range(5):
            for pw2 in range(5):
                for ci in range(6):
                    m2e[kh, (2 * pw2 + kw) * 6 + ci,
                        pw2 * 16:(pw2 + 1) * 16] = w2[:, ci, kh, kw]
                    m2o[kh, (2 * pw2 + 1 + kw) * 6 + ci,
                        pw2 * 16:(pw2 + 1) * 16] = w2[:, ci, kh, kw]
    b2t = np.tile(b2, 5).reshape(1, 80)

    # fc1 banded over the 5 pooled rows; folds PyTorch's NCHW .view(-1,400)
    # (c, h, w) flatten order into the (ph, pw*16+c) lane layout:
    #   w3[ph, q*16+co, j] = fc1_w[j, co*25 + ph*5 + q]
    w3 = np.ascontiguousarray(
        f1.reshape(120, 16, 5, 5).transpose(2, 3, 1, 0))       # (ph, q, co, j)
    w3 = w3.reshape(5, 80, 120)

    # fc3 weight/bias zero-padded to 128 lanes for a lane-dense output store.
    w5 = np.zeros((84, 128), np.float32)
    w5[:, :num_classes] = f3.T
    b5 = np.zeros((1, 128), np.float32)
    b5[0, :num_classes] = np.asarray(p["fc3_b"], np.float32)

    return {
        "m1e": jnp.asarray(m1e), "m1o": jnp.asarray(m1o),
        "b1": jnp.asarray(b1t),
        "selh1": jnp.asarray(selh1),
        "m2e": jnp.asarray(m2e), "m2o": jnp.asarray(m2o),
        "b2": jnp.asarray(b2t),
        "selh2": jnp.asarray(selh2),
        "w3": jnp.asarray(w3),
        "b3": jnp.asarray(np.asarray(p["fc1_b"], np.float32).reshape(1, 120)),
        "w4": jnp.asarray(np.ascontiguousarray(f2.T)),
        "b4": jnp.asarray(np.asarray(p["fc2_b"], np.float32).reshape(1, 84)),
        "w5": jnp.asarray(w5),
        "b5": jnp.asarray(b5),
    }


# ----------------------------- pure-JAX reference ----------------------------

def cnn_small_reference(params, x):
    """Plain XLA forward matching the PyTorch module (for a sanity check)."""
    hi = jax.lax.Precision.HIGHEST
    y = jax.lax.conv_general_dilated(
        x, params["conv1_w"], (1, 1), "VALID",
        dimension_numbers=("NCHW", "OIHW", "NCHW"), precision=hi)
    y = jnp.maximum(y + params["conv1_b"][None, :, None, None], 0.0)
    y = jax.lax.reduce_window(y, -jnp.inf, jax.lax.max,
                              (1, 1, 2, 2), (1, 1, 2, 2), "VALID")
    y = jax.lax.conv_general_dilated(
        y, params["conv2_w"], (1, 1), "VALID",
        dimension_numbers=("NCHW", "OIHW", "NCHW"), precision=hi)
    y = jnp.maximum(y + params["conv2_b"][None, :, None, None], 0.0)
    y = jax.lax.reduce_window(y, -jnp.inf, jax.lax.max,
                              (1, 1, 2, 2), (1, 1, 2, 2), "VALID")
    y = y.reshape(y.shape[0], -1)                              # (B, 400) NCHW
    y = jnp.maximum(jnp.dot(y, params["fc1_w"].T, precision=hi)
                    + params["fc1_b"], 0.0)
    y = jnp.maximum(jnp.dot(y, params["fc2_w"].T, precision=hi)
                    + params["fc2_b"], 0.0)
    return jnp.dot(y, params["fc3_w"].T, precision=hi) + params["fc3_b"]


# ----------------------------------- main -------------------------------------

if __name__ == "__main__":
    key = jax.random.PRNGKey(0)
    k_param, k_x = jax.random.split(key)

    params = init_params(k_param, num_classes=10)
    prepped = prepare_params(params, num_classes=10)

    # CNN_small's forward implies 1-channel 32x32 inputs (16*5*5 flatten).
    x = jax.random.normal(k_x, (2, 1, 32, 32), dtype=jnp.float32)

    fwd = jax.jit(cnn_small_forward, static_argnames=("num_classes",))
    out = fwd(prepped, x, num_classes=10)
    out = jax.block_until_ready(out)

    assert out.shape == (2, 10), out.shape
    assert bool(jnp.all(jnp.isfinite(out)))

    # Sanity check against the plain-XLA reference (loose tolerance only to
    # absorb MXU vs. XLA f32 accumulation differences).
    ref = cnn_small_reference(params, x)
    max_err = float(jnp.max(jnp.abs(out - ref)))
    assert max_err < 3e-2, max_err

    print("KERNEL_OK")
</pallas_src>

<mosaic_0001>
module attributes {stable_mosaic.version = 11 : i64} {
  func.func @_cnn_small_kernel(%arg0: i32, %arg1: memref<1x1x32x32xf32, #tpu.memory_space<vmem>>, %arg2: memref<5x32x84xf32, #tpu.memory_space<vmem>>, %arg3: memref<5x32x84xf32, #tpu.memory_space<vmem>>, %arg4: memref<1x84xf32, #tpu.memory_space<vmem>>, %arg5: memref<2x14x28xf32, #tpu.memory_space<vmem>>, %arg6: memref<5x84x80xf32, #tpu.memory_space<vmem>>, %arg7: memref<5x84x80xf32, #tpu.memory_space<vmem>>, %arg8: memref<1x80xf32, #tpu.memory_space<vmem>>, %arg9: memref<2x5x10xf32, #tpu.memory_space<vmem>>, %arg10: memref<5x80x120xf32, #tpu.memory_space<vmem>>, %arg11: memref<1x120xf32, #tpu.memory_space<vmem>>, %arg12: memref<120x84xf32, #tpu.memory_space<vmem>>, %arg13: memref<1x84xf32, #tpu.memory_space<vmem>>, %arg14: memref<84x128xf32, #tpu.memory_space<vmem>>, %arg15: memref<1x128xf32, #tpu.memory_space<vmem>>, %arg16: memref<1x1x128xf32, #tpu.memory_space<vmem>>) attributes {dimension_semantics = [#tpu.dimension_semantics<parallel>], iteration_bounds = array<i64: 2>, scalar_prefetch = 0 : i64, scratch_operands = 0 : i64, tpu.core_type = #tpu.core_type<tc>, window_params = [{transform_indices = @transform_0, window_bounds = array<i64: 1, 1, 32, 32>}, {pipeline_mode = #tpu.pipeline_mode<synchronous>, transform_indices = @transform_1, window_bounds = array<i64: 5, 32, 84>}, {pipeline_mode = #tpu.pipeline_mode<synchronous>, transform_indices = @transform_2, window_bounds = array<i64: 5, 32, 84>}, {pipeline_mode = #tpu.pipeline_mode<synchronous>, transform_indices = @transform_3, window_bounds = array<i64: 1, 84>}, {pipeline_mode = #tpu.pipeline_mode<synchronous>, transform_indices = @transform_4, window_bounds = array<i64: 2, 14, 28>}, {pipeline_mode = #tpu.pipeline_mode<synchronous>, transform_indices = @transform_5, window_bounds = array<i64: 5, 84, 80>}, {pipeline_mode = #tpu.pipeline_mode<synchronous>, transform_indices = @transform_6, window_bounds = array<i64: 5, 84, 80>}, {pipeline_mode = #tpu.pipeline_mode<synchronous>, transform_indices = @transform_7, window_bounds = array<i64: 1, 80>}, {pipeline_mode = #tpu.pipeline_mode<synchronous>, transform_indices = @transform_8, window_bounds = array<i64: 2, 5, 10>}, {pipeline_mode = #tpu.pipeline_mode<synchronous>, transform_indices = @transform_9, window_bounds = array<i64: 5, 80, 120>}, {pipeline_mode = #tpu.pipeline_mode<synchronous>, transform_indices = @transform_10, window_bounds = array<i64: 1, 120>}, {pipeline_mode = #tpu.pipeline_mode<synchronous>, transform_indices = @transform_11, window_bounds = array<i64: 120, 84>}, {pipeline_mode = #tpu.pipeline_mode<synchronous>, transform_indices = @transform_12, window_bounds = array<i64: 1, 84>}, {pipeline_mode = #tpu.pipeline_mode<synchronous>, transform_indices = @transform_13, window_bounds = array<i64: 84, 128>}, {pipeline_mode = #tpu.pipeline_mode<synchronous>, transform_indices = @transform_14, window_bounds = array<i64: 1, 128>}, {transform_indices = @transform_15, window_bounds = array<i64: 1, 1, 128>}]} {
    %c0 = arith.constant 0 : index
    %c0_0 = arith.constant 0 : index
    %c0_1 = arith.constant 0 : index
    %c0_2 = arith.constant 0 : index
    %0 = vector.load %arg1[%c0, %c0_0, %c0_1, %c0_2] : memref<1x1x32x32xf32, #tpu.memory_space<vmem>>, vector<1x1x32x32xf32>
    %1 = vector.shape_cast %0 : vector<1x1x32x32xf32> to vector<32x32xf32>
    %2 = vector.extract_strided_slice %1 {offsets = [0, 0], sizes = [28, 32], strides = [1, 1]} : vector<32x32xf32> to vector<28x32xf32>
    %c0_3 = arith.constant 0 : index
    %c0_4 = arith.constant 0 : index
    %c0_5 = arith.constant 0 : index
    %3 = vector.load %arg2[%c0_3, %c0_4, %c0_5] : memref<5x32x84xf32, #tpu.memory_space<vmem>>, vector<1x32x84xf32>
    %4 = vector.shape_cast %3 : vector<1x32x84xf32> to vector<32x84xf32>
    %cst = arith.constant dense<0.000000e+00> : vector<28x84xf32>
    %5 = tpu.matmul %2, %4, %cst {dimension_numbers = #tpu.dot_dimension_numbers<[1], [0], [0], [1], [0, 0, 1, 1], [], []>} : vector<28x32xf32>, vector<32x84xf32>, vector<28x84xf32> -> vector<28x84xf32>
    %c0_6 = arith.constant 0 : index
    %c0_7 = arith.constant 0 : index
    %c0_8 = arith.constant 0 : index
    %6 = vector.load %arg3[%c0_6, %c0_7, %c0_8] : memref<5x32x84xf32, #tpu.memory_space<vmem>>, vector<1x32x84xf32>
    %7 = vector.shape_cast %6 : vector<1x32x84xf32> to vector<32x84xf32>
    %cst_9 = arith.constant dense<0.000000e+00> : vector<28x84xf32>
    %8 = tpu.matmul %2, %7, %cst_9 {dimension_numbers = #tpu.dot_dimension_numbers<[1], [0], [0], [1], [0, 0, 1, 1], [], []>} : vector<28x32xf32>, vector<32x84xf32>, vector<28x84xf32> -> vector<28x84xf32>
    %9 = vector.extract_strided_slice %1 {offsets = [1, 0], sizes = [28, 32], strides = [1, 1]} : vector<32x32xf32> to vector<28x32xf32>
    %c1 = arith.constant 1 : index
    %c0_10 = arith.constant 0 : index
    %c0_11 = arith.constant 0 : index
    %10 = vector.load %arg2[%c1, %c0_10, %c0_11] : memref<5x32x84xf32, #tpu.memory_space<vmem>>, vector<1x32x84xf32>
    %11 = vector.shape_cast %10 : vector<1x32x84xf32> to vector<32x84xf32>
    %cst_12 = arith.constant dense<0.000000e+00> : vector<28x84xf32>
    %12 = tpu.matmul %9, %11, %cst_12 {dimension_numbers = #tpu.dot_dimension_numbers<[1], [0], [0], [1], [0, 0, 1, 1], [], []>} : vector<28x32xf32>, vector<32x84xf32>, vector<28x84xf32> -> vector<28x84xf32>
    %c1_13 = arith.constant 1 : index
    %c0_14 = arith.constant 0 : index
    %c0_15 = arith.constant 0 : index
    %13 = vector.load %arg3[%c1_13, %c0_14, %c0_15] : memref<5x32x84xf32, #tpu.memory_space<vmem>>, vector<1x32x84xf32>
    %14 = vector.shape_cast %13 : vector<1x32x84xf32> to vector<32x84xf32>
    %cst_16 = arith.constant dense<0.000000e+00> : vector<28x84xf32>
    %15 = tpu.matmul %9, %14, %cst_16 {dimension_numbers = #tpu.dot_dimension_numbers<[1], [0], [0], [1], [0, 0, 1, 1], [], []>} : vector<28x32xf32>, vector<32x84xf32>, vector<28x84xf32> -> vector<28x84xf32>
    %16 = arith.addf %5, %12 : vector<28x84xf32>
    %17 = arith.addf %8, %15 : vector<28x84xf32>
    %18 = vector.extract_strided_slice %1 {offsets = [2, 0], sizes = [28, 32], strides = [1, 1]} : vector<32x32xf32> to vector<28x32xf32>
    %c2 = arith.constant 2 : index
    %c0_17 = arith.constant 0 : index
    %c0_18 = arith.constant 0 : index
    %19 = vector.load %arg2[%c2, %c0_17, %c0_18] : memref<5x32x84xf32, #tpu.memory_space<vmem>>, vector<1x32x84xf32>
    %20 = vector.shape_cast %19 : vector<1x32x84xf32> to vector<32x84xf32>
    %cst_19 = arith.constant dense<0.000000e+00> : vector<28x84xf32>
    %21 = tpu.matmul %18, %20, %cst_19 {dimension_numbers = #tpu.dot_dimension_numbers<[1], [0], [0], [1], [0, 0, 1, 1], [], []>} : vector<28x32xf32>, vector<32x84xf32>, vector<28x84xf32> -> vector<28x84xf32>
    %c2_20 = arith.constant 2 : index
    %c0_21 = arith.constant 0 : index
    %c0_22 = arith.constant 0 : index
    %22 = vector.load %arg3[%c2_20, %c0_21, %c0_22] : memref<5x32x84xf32, #tpu.memory_space<vmem>>, vector<1x32x84xf32>
    %23 = vector.shape_cast %22 : vector<1x32x84xf32> to vector<32x84xf32>
    %cst_23 = arith.constant dense<0.000000e+00> : vector<28x84xf32>
    %24 = tpu.matmul %18, %23, %cst_23 {dimension_numbers = #tpu.dot_dimension_numbers<[1], [0], [0], [1], [0, 0, 1, 1], [], []>} : vector<28x32xf32>, vector<32x84xf32>, vector<28x84xf32> -> vector<28x84xf32>
    %25 = arith.addf %16, %21 : vector<28x84xf32>
    %26 = arith.addf %17, %24 : vector<28x84xf32>
    %27 = vector.extract_strided_slice %1 {offsets = [3, 0], sizes = [28, 32], strides = [1, 1]} : vector<32x32xf32> to vector<28x32xf32>
    %c3 = arith.constant 3 : index
    %c0_24 = arith.constant 0 : index
    %c0_25 = arith.constant 0 : index
    %28 = vector.load %arg2[%c3, %c0_24, %c0_25] : memref<5x32x84xf32, #tpu.memory_space<vmem>>, vector<1x32x84xf32>
    %29 = vector.shape_cast %28 : vector<1x32x84xf32> to vector<32x84xf32>
    %cst_26 = arith.constant dense<0.000000e+00> : vector<28x84xf32>
    %30 = tpu.matmul %27, %29, %cst_26 {dimension_numbers = #tpu.dot_dimension_numbers<[1], [0], [0], [1], [0, 0, 1, 1], [], []>} : vector<28x32xf32>, vector<32x84xf32>, vector<28x84xf32> -> vector<28x84xf32>
    %c3_27 = arith.constant 3 : index
    %c0_28 = arith.constant 0 : index
    %c0_29 = arith.constant 0 : index
    %31 = vector.load %arg3[%c3_27, %c0_28, %c0_29] : memref<5x32x84xf32, #tpu.memory_space<vmem>>, vector<1x32x84xf32>
    %32 = vector.shape_cast %31 : vector<1x32x84xf32> to vector<32x84xf32>
    %cst_30 = arith.constant dense<0.000000e+00> : vector<28x84xf32>
    %33 = tpu.matmul %27, %32, %cst_30 {dimension_numbers = #tpu.dot_dimension_numbers<[1], [0], [0], [1], [0, 0, 1, 1], [], []>} : vector<28x32xf32>, vector<32x84xf32>, vector<28x84xf32> -> vector<28x84xf32>
    %34 = arith.addf %25, %30 : vector<28x84xf32>
    %35 = arith.addf %26, %33 : vector<28x84xf32>
    %36 = vector.extract_strided_slice %1 {offsets = [4, 0], sizes = [28, 32], strides = [1, 1]} : vector<32x32xf32> to vector<28x32xf32>
    %c4 = arith.constant 4 : index
    %c0_31 = arith.constant 0 : index
    %c0_32 = arith.constant 0 : index
    %37 = vector.load %arg2[%c4, %c0_31, %c0_32] : memref<5x32x84xf32, #tpu.memory_space<vmem>>, vector<1x32x84xf32>
    %38 = vector.shape_cast %37 : vector<1x32x84xf32> to vector<32x84xf32>
    %cst_33 = arith.constant dense<0.000000e+00> : vector<28x84xf32>
    %39 = tpu.matmul %36, %38, %cst_33 {dimension_numbers = #tpu.dot_dimension_numbers<[1], [0], [0], [1], [0, 0, 1, 1], [], []>} : vector<28x32xf32>, vector<32x84xf32>, vector<28x84xf32> -> vector<28x84xf32>
    %c4_34 = arith.constant 4 : index
    %c0_35 = arith.constant 0 : index
    %c0_36 = arith.constant 0 : index
    %40 = vector.load %arg3[%c4_34, %c0_35, %c0_36] : memref<5x32x84xf32, #tpu.memory_space<vmem>>, vector<1x32x84xf32>
    %41 = vector.shape_cast %40 : vector<1x32x84xf32> to vector<32x84xf32>
    %cst_37 = arith.constant dense<0.000000e+00> : vector<28x84xf32>
    %42 = tpu.matmul %36, %41, %cst_37 {dimension_numbers = #tpu.dot_dimension_numbers<[1], [0], [0], [1], [0, 0, 1, 1], [], []>} : vector<28x32xf32>, vector<32x84xf32>, vector<28x84xf32> -> vector<28x84xf32>
    %43 = arith.addf %34, %39 : vector<28x84xf32>
    %44 = arith.addf %35, %42 : vector<28x84xf32>
    %45 = arith.maximumf %43, %44 : vector<28x84xf32>
    %c0_38 = arith.constant 0 : index
    %c0_39 = arith.constant 0 : index
    %46 = vector.load %arg4[%c0_38, %c0_39] : memref<1x84xf32, #tpu.memory_space<vmem>>, vector<1x84xf32>
    %47 = vector.broadcast %46 : vector<1x84xf32> to vector<28x84xf32>
    %48 = arith.addf %45, %47 : vector<28x84xf32>
    %cst_40 = arith.constant 0.000000e+00 : f32
    %49 = vector.broadcast %cst_40 : f32 to vector<28x84xf32>
    %50 = arith.maximumf %48, %49 : vector<28x84xf32>
    %c0_41 = arith.constant 0 : index
    %c0_42 = arith.constant 0 : index
    %c0_43 = arith.constant 0 : index
    %51 = vector.load %arg5[%c0_41, %c0_42, %c0_43] : memref<2x14x28xf32, #tpu.memory_space<vmem>>, vector<1x14x28xf32>
    %52 = vector.shape_cast %51 : vector<1x14x28xf32> to vector<14x28xf32>
    %cst_44 = arith.constant dense<0.000000e+00> : vector<14x84xf32>
    %53 = tpu.matmul %52, %50, %cst_44 {dimension_numbers = #tpu.dot_dimension_numbers<[1], [0], [0], [1], [0, 0, 1, 1], [], []>} : vector<14x28xf32>, vector<28x84xf32>, vector<14x84xf32> -> vector<14x84xf32>
    %c1_45 = arith.constant 1 : index
    %c0_46 = arith.constant 0 : index
    %c0_47 = arith.constant 0 : index
    %54 = vector.load %arg5[%c1_45, %c0_46, %c0_47] : memref<2x14x28xf32, #tpu.memory_space<vmem>>, vector<1x14x28xf32>
    %55 = vector.shape_cast %54 : vector<1x14x28xf32> to vector<14x28xf32>
    %cst_48 = arith.constant dense<0.000000e+00> : vector<14x84xf32>
    %56 = tpu.matmul %55, %50, %cst_48 {dimension_numbers = #tpu.dot_dimension_numbers<[1], [0], [0], [1], [0, 0, 1, 1], [], []>} : vector<14x28xf32>, vector<28x84xf32>, vector<14x84xf32> -> vector<14x84xf32>
    %57 = arith.maximumf %53, %56 : vector<14x84xf32>
    %58 = vector.extract_strided_slice %57 {offsets = [0, 0], sizes = [10, 84], strides = [1, 1]} : vector<14x84xf32> to vector<10x84xf32>
    %c0_49 = arith.constant 0 : index
    %c0_50 = arith.constant 0 : index
    %c0_51 = arith.constant 0 : index
    %59 = vector.load %arg6[%c0_49, %c0_50, %c0_51] : memref<5x84x80xf32, #tpu.memory_space<vmem>>, vector<1x84x80xf32>
    %60 = vector.shape_cast %59 : vector<1x84x80xf32> to vector<84x80xf32>
    %cst_52 = arith.constant dense<0.000000e+00> : vector<10x80xf32>
    %61 = tpu.matmul %58, %60, %cst_52 {dimension_numbers = #tpu.dot_dimension_numbers<[1], [0], [0], [1], [0, 0, 1, 1], [], []>} : vector<10x84xf32>, vector<84x80xf32>, vector<10x80xf32> -> vector<10x80xf32>
    %c0_53 = arith.constant 0 : index
    %c0_54 = arith.constant 0 : index
    %c0_55 = arith.constant 0 : index
    %62 = vector.load %arg7[%c0_53, %c0_54, %c0_55] : memref<5x84x80xf32, #tpu.memory_space<vmem>>, vector<1x84x80xf32>
    %63 = vector.shape_cast %62 : vector<1x84x80xf32> to vector<84x80xf32>
    %cst_56 = arith.constant dense<0.000000e+00> : vector<10x80xf32>
    %64 = tpu.matmul %58, %63, %cst_56 {dimension_numbers = #tpu.dot_dimension_numbers<[1], [0], [0], [1], [0, 0, 1, 1], [], []>} : vector<10x84xf32>, vector<84x80xf32>, vector<10x80xf32> -> vector<10x80xf32>
    %65 = vector.extract_strided_slice %57 {offsets = [1, 0], sizes = [10, 84], strides = [1, 1]} : vector<14x84xf32> to vector<10x84xf32>
    %c1_57 = arith.constant 1 : index
    %c0_58 = arith.constant 0 : index
    %c0_59 = arith.constant 0 : index
    %66 = vector.load %arg6[%c1_57, %c0_58, %c0_59] : memref<5x84x80xf32, #tpu.memory_space<vmem>>, vector<1x84x80xf32>
    %67 = vector.shape_cast %66 : vector<1x84x80xf32> to vector<84x80xf32>
    %cst_60 = arith.constant dense<0.000000e+00> : vector<10x80xf32>
    %68 = tpu.matmul %65, %67, %cst_60 {dimension_numbers = #tpu.dot_dimension_numbers<[1], [0], [0], [1], [0, 0, 1, 1], [], []>} : vector<10x84xf32>, vector<84x80xf32>, vector<10x80xf32> -> vector<10x80xf32>
    %c1_61 = arith.constant 1 : index
    %c0_62 = arith.constant 0 : index
    %c0_63 = arith.constant 0 : index
    %69 = vector.load %arg7[%c1_61, %c0_62, %c0_63] : memref<5x84x80xf32, #tpu.memory_space<vmem>>, vector<1x84x80xf32>
    %70 = vector.shape_cast %69 : vector<1x84x80xf32> to vector<84x80xf32>
    %cst_64 = arith.constant dense<0.000000e+00> : vector<10x80xf32>
    %71 = tpu.matmul %65, %70, %cst_64 {dimension_numbers = #tpu.dot_dimension_numbers<[1], [0], [0], [1], [0, 0, 1, 1], [], []>} : vector<10x84xf32>, vector<84x80xf32>, vector<10x80xf32> -> vector<10x80xf32>
    %72 = arith.addf %61, %68 : vector<10x80xf32>
    %73 = arith.addf %64, %71 : vector<10x80xf32>
    %74 = vector.extract_strided_slice %57 {offsets = [2, 0], sizes = [10, 84], strides = [1, 1]} : vector<14x84xf32> to vector<10x84xf32>
    %c2_65 = arith.constant 2 : index
    %c0_66 = arith.constant 0 : index
    %c0_67 = arith.constant 0 : index
    %75 = vector.load %arg6[%c2_65, %c0_66, %c0_67] : memref<5x84x80xf32, #tpu.memory_space<vmem>>, vector<1x84x80xf32>
    %76 = vector.shape_cast %75 : vector<1x84x80xf32> to vector<84x80xf32>
    %cst_68 = arith.constant dense<0.000000e+00> : vector<10x80xf32>
    %77 = tpu.matmul %74, %76, %cst_68 {dimension_numbers = #tpu.dot_dimension_numbers<[1], [0], [0], [1], [0, 0, 1, 1], [], []>} : vector<10x84xf32>, vector<84x80xf32>, vector<10x80xf32> -> vector<10x80xf32>
    %c2_69 = arith.constant 2 : index
    %c0_70 = arith.constant 0 : index
    %c0_71 = arith.constant 0 : index
    %78 = vector.load %arg7[%c2_69, %c0_70, %c0_71] : memref<5x84x80xf32, #tpu.memory_space<vmem>>, vector<1x84x80xf32>
    %79 = vector.shape_cast %78 : vector<1x84x80xf32> to vector<84x80xf32>
    %cst_72 = arith.constant dense<0.000000e+00> : vector<10x80xf32>
    %80 = tpu.matmul %74, %79, %cst_72 {dimension_numbers = #tpu.dot_dimension_numbers<[1], [0], [0], [1], [0, 0, 1, 1], [], []>} : vector<10x84xf32>, vector<84x80xf32>, vector<10x80xf32> -> vector<10x80xf32>
    %81 = arith.addf %72, %77 : vector<10x80xf32>
    %82 = arith.addf %73, %80 : vector<10x80xf32>
    %83 = vector.extract_strided_slice %57 {offsets = [3, 0], sizes = [10, 84], strides = [1, 1]} : vector<14x84xf32> to vector<10x84xf32>
    %c3_73 = arith.constant 3 : index
    %c0_74 = arith.constant 0 : index
    %c0_75 = arith.constant 0 : index
    %84 = vector.load %arg6[%c3_73, %c0_74, %c0_75] : memref<5x84x80xf32, #tpu.memory_space<vmem>>, vector<1x84x80xf32>
    %85 = vector.shape_cast %84 : vector<1x84x80xf32> to vector<84x80xf32>
    %cst_76 = arith.constant dense<0.000000e+00> : vector<10x80xf32>
    %86 = tpu.matmul %83, %85, %cst_76 {dimension_numbers = #tpu.dot_dimension_numbers<[1], [0], [0], [1], [0, 0, 1, 1], [], []>} : vector<10x84xf32>, vector<84x80xf32>, vector<10x80xf32> -> vector<10x80xf32>
    %c3_77 = arith.constant 3 : index
    %c0_78 = arith.constant 0 : index
    %c0_79 = arith.constant 0 : index
    %87 = vector.load %arg7[%c3_77, %c0_78, %c0_79] : memref<5x84x80xf32, #tpu.memory_space<vmem>>, vector<1x84x80xf32>
    %88 = vector.shape_cast %87 : vector<1x84x80xf32> to vector<84x80xf32>
    %cst_80 = arith.constant dense<0.000000e+00> : vector<10x80xf32>
    %89 = tpu.matmul %83, %88, %cst_80 {dimension_numbers = #tpu.dot_dimension_numbers<[1], [0], [0], [1], [0, 0, 1, 1], [], []>} : vector<10x84xf32>, vector<84x80xf32>, vector<10x80xf32> -> vector<10x80xf32>
    %90 = arith.addf %81, %86 : vector<10x80xf32>
    %91 = arith.addf %82, %89 : vector<10x80xf32>
    %92 = vector.extract_strided_slice %57 {offsets = [4, 0], sizes = [10, 84], strides = [1, 1]} : vector<14x84xf32> to vector<10x84xf32>
    %c4_81 = arith.constant 4 : index
    %c0_82 = arith.constant 0 : index
    %c0_83 = arith.constant 0 : index
    %93 = vector.load %arg6[%c4_81, %c0_82, %c0_83] : memref<5x84x80xf32, #tpu.memory_space<vmem>>, vector<1x84x80xf32>
    %94 = vector.shape_cast %93 : vector<1x84x80xf32> to vector<84x80xf32>
    %cst_84 = arith.constant dense<0.000000e+00> : vector<10x80xf32>
    %95 = tpu.matmul %92, %94, %cst_84 {dimension_numbers = #tpu.dot_dimension_numbers<[1], [0], [0], [1], [0, 0, 1, 1], [], []>} : vector<10x84xf32>, vector<84x80xf32>, vector<10x80xf32> -> vector<10x80xf32>
    %c4_85 = arith.constant 4 : index
    %c0_86 = arith.constant 0 : index
    %c0_87 = arith.constant 0 : index
    %96 = vector.load %arg7[%c4_85, %c0_86, %c0_87] : memref<5x84x80xf32, #tpu.memory_space<vmem>>, vector<1x84x80xf32>
    %97 = vector.shape_cast %96 : vector<1x84x80xf32> to vector<84x80xf32>
    %cst_88 = arith.constant dense<0.000000e+00> : vector<10x80xf32>
    %98 = tpu.matmul %92, %97, %cst_88 {dimension_numbers = #tpu.dot_dimension_numbers<[1], [0], [0], [1], [0, 0, 1, 1], [], []>} : vector<10x84xf32>, vector<84x80xf32>, vector<10x80xf32> -> vector<10x80xf32>
    %99 = arith.addf %90, %95 : vector<10x80xf32>
    %100 = arith.addf %91, %98 : vector<10x80xf32>
    %101 = arith.maximumf %99, %100 : vector<10x80xf32>
    %c0_89 = arith.constant 0 : index
    %c0_90 = arith.constant 0 : index
    %102 = vector.load %arg8[%c0_89, %c0_90] : memref<1x80xf32, #tpu.memory_space<vmem>>, vector<1x80xf32>
    %103 = vector.broadcast %102 : vector<1x80xf32> to vector<10x80xf32>
    %104 = arith.addf %101, %103 : vector<10x80xf32>
    %cst_91 = arith.constant 0.000000e+00 : f32
    %105 = vector.broadcast %cst_91 : f32 to vector<10x80xf32>
    %106 = arith.maximumf %104, %105 : vector<10x80xf32>
    %c0_92 = arith.constant 0 : index
    %c0_93 = arith.constant 0 : index
    %c0_94 = arith.constant 0 : index
    %107 = vector.load %arg9[%c0_92, %c0_93, %c0_94] : memref<2x5x10xf32, #tpu.memory_space<vmem>>, vector<1x5x10xf32>
    %108 = vector.shape_cast %107 : vector<1x5x10xf32> to vector<5x10xf32>
    %cst_95 = arith.constant dense<0.000000e+00> : vector<5x80xf32>
    %109 = tpu.matmul %108, %106, %cst_95 {dimension_numbers = #tpu.dot_dimension_numbers<[1], [0], [0], [1], [0, 0, 1, 1], [], []>} : vector<5x10xf32>, vector<10x80xf32>, vector<5x80xf32> -> vector<5x80xf32>
    %c1_96 = arith.constant 1 : index
    %c0_97 = arith.constant 0 : index
    %c0_98 = arith.constant 0 : index
    %110 = vector.load %arg9[%c1_96, %c0_97, %c0_98] : memref<2x5x10xf32, #tpu.memory_space<vmem>>, vector<1x5x10xf32>
    %111 = vector.shape_cast %110 : vector<1x5x10xf32> to vector<5x10xf32>
    %cst_99 = arith.constant dense<0.000000e+00> : vector<5x80xf32>
    %112 = tpu.matmul %111, %106, %cst_99 {dimension_numbers = #tpu.dot_dimension_numbers<[1], [0], [0], [1], [0, 0, 1, 1], [], []>} : vector<5x10xf32>, vector<10x80xf32>, vector<5x80xf32> -> vector<5x80xf32>
    %113 = arith.maximumf %109, %112 : vector<5x80xf32>
    %114 = vector.extract_strided_slice %113 {offsets = [0, 0], sizes = [1, 80], strides = [1, 1]} : vector<5x80xf32> to vector<1x80xf32>
    %c0_100 = arith.constant 0 : index
    %c0_101 = arith.constant 0 : index
    %c0_102 = arith.constant 0 : index
    %115 = vector.load %arg10[%c0_100, %c0_101, %c0_102] : memref<5x80x120xf32, #tpu.memory_space<vmem>>, vector<1x80x120xf32>
    %116 = vector.shape_cast %115 : vector<1x80x120xf32> to vector<80x120xf32>
    %cst_103 = arith.constant dense<0.000000e+00> : vector<1x120xf32>
    %117 = tpu.matmul %114, %116, %cst_103 {dimension_numbers = #tpu.dot_dimension_numbers<[1], [0], [0], [1], [0, 0, 1, 1], [], []>} : vector<1x80xf32>, vector<80x120xf32>, vector<1x120xf32> -> vector<1x120xf32>
    %118 = vector.extract_strided_slice %113 {offsets = [1, 0], sizes = [1, 80], strides = [1, 1]} : vector<5x80xf32> to vector<1x80xf32>
    %c1_104 = arith.constant 1 : index
    %c0_105 = arith.constant 0 : index
    %c0_106 = arith.constant 0 : index
    %119 = vector.load %arg10[%c1_104, %c0_105, %c0_106] : memref<5x80x120xf32, #tpu.memory_space<vmem>>, vector<1x80x120xf32>
    %120 = vector.shape_cast %119 : vector<1x80x120xf32> to vector<80x120xf32>
    %cst_107 = arith.constant dense<0.000000e+00> : vector<1x120xf32>
    %121 = tpu.matmul %118, %120, %cst_107 {dimension_numbers = #tpu.dot_dimension_numbers<[1], [0], [0], [1], [0, 0, 1, 1], [], []>} : vector<1x80xf32>, vector<80x120xf32>, vector<1x120xf32> -> vector<1x120xf32>
    %122 = arith.addf %117, %121 : vector<1x120xf32>
    %123 = vector.extract_strided_slice %113 {offsets = [2, 0], sizes = [1, 80], strides = [1, 1]} : vector<5x80xf32> to vector<1x80xf32>
    %c2_108 = arith.constant 2 : index
    %c0_109 = arith.constant 0 : index
    %c0_110 = arith.constant 0 : index
    %124 = vector.load %arg10[%c2_108, %c0_109, %c0_110] : memref<5x80x120xf32, #tpu.memory_space<vmem>>, vector<1x80x120xf32>
    %125 = vector.shape_cast %124 : vector<1x80x120xf32> to vector<80x120xf32>
    %cst_111 = arith.constant dense<0.000000e+00> : vector<1x120xf32>
    %126 = tpu.matmul %123, %125, %cst_111 {dimension_numbers = #tpu.dot_dimension_numbers<[1], [0], [0], [1], [0, 0, 1, 1], [], []>} : vector<1x80xf32>, vector<80x120xf32>, vector<1x120xf32> -> vector<1x120xf32>
    %127 = arith.addf %122, %126 : vector<1x120xf32>
    %128 = vector.extract_strided_slice %113 {offsets = [3, 0], sizes = [1, 80], strides = [1, 1]} : vector<5x80xf32> to vector<1x80xf32>
    %c3_112 = arith.constant 3 : index
    %c0_113 = arith.constant 0 : index
    %c0_114 = arith.constant 0 : index
    %129 = vector.load %arg10[%c3_112, %c0_113, %c0_114] : memref<5x80x120xf32, #tpu.memory_space<vmem>>, vector<1x80x120xf32>
    %130 = vector.shape_cast %129 : vector<1x80x120xf32> to vector<80x120xf32>
    %cst_115 = arith.constant dense<0.000000e+00> : vector<1x120xf32>
    %131 = tpu.matmul %128, %130, %cst_115 {dimension_numbers = #tpu.dot_dimension_numbers<[1], [0], [0], [1], [0, 0, 1, 1], [], []>} : vector<1x80xf32>, vector<80x120xf32>, vector<1x120xf32> -> vector<1x120xf32>
    %132 = arith.addf %127, %131 : vector<1x120xf32>
    %133 = vector.extract_strided_slice %113 {offsets = [4, 0], sizes = [1, 80], strides = [1, 1]} : vector<5x80xf32> to vector<1x80xf32>
    %c4_116 = arith.constant 4 : index
    %c0_117 = arith.constant 0 : index
    %c0_118 = arith.constant 0 : index
    %134 = vector.load %arg10[%c4_116, %c0_117, %c0_118] : memref<5x80x120xf32, #tpu.memory_space<vmem>>, vector<1x80x120xf32>
    %135 = vector.shape_cast %134 : vector<1x80x120xf32> to vector<80x120xf32>
    %cst_119 = arith.constant dense<0.000000e+00> : vector<1x120xf32>
    %136 = tpu.matmul %133, %135, %cst_119 {dimension_numbers = #tpu.dot_dimension_numbers<[1], [0], [0], [1], [0, 0, 1, 1], [], []>} : vector<1x80xf32>, vector<80x120xf32>, vector<1x120xf32> -> vector<1x120xf32>
    %137 = arith.addf %132, %136 : vector<1x120xf32>
    %c0_120 = arith.constant 0 : index
    %c0_121 = arith.constant 0 : index
    %138 = vector.load %arg11[%c0_120, %c0_121] : memref<1x120xf32, #tpu.memory_space<vmem>>, vector<1x120xf32>
    %139 = arith.addf %137, %138 : vector<1x120xf32>
    %cst_122 = arith.constant 0.000000e+00 : f32
    %140 = vector.broadcast %cst_122 : f32 to vector<1x120xf32>
    %141 = arith.maximumf %139, %140 : vector<1x120xf32>
    %c0_123 = arith.constant 0 : index
    %c0_124 = arith.constant 0 : index
    %142 = vector.load %arg12[%c0_123, %c0_124] : memref<120x84xf32, #tpu.memory_space<vmem>>, vector<120x84xf32>
    %cst_125 = arith.constant dense<0.000000e+00> : vector<1x84xf32>
    %143 = tpu.matmul %141, %142, %cst_125 {dimension_numbers = #tpu.dot_dimension_numbers<[1], [0], [0], [1], [0, 0, 1, 1], [], []>} : vector<1x120xf32>, vector<120x84xf32>, vector<1x84xf32> -> vector<1x84xf32>
    %c0_126 = arith.constant 0 : index
    %c0_127 = arith.constant 0 : index
    %144 = vector.load %arg13[%c0_126, %c0_127] : memref<1x84xf32, #tpu.memory_space<vmem>>, vector<1x84xf32>
    %145 = arith.addf %143, %144 : vector<1x84xf32>
    %cst_128 = arith.constant 0.000000e+00 : f32
    %146 = vector.broadcast %cst_128 : f32 to vector<1x84xf32>
    %147 = arith.maximumf %145, %146 : vector<1x84xf32>
    %c0_129 = arith.constant 0 : index
    %c0_130 = arith.constant 0 : index
    %148 = vector.load %arg14[%c0_129, %c0_130] : memref<84x128xf32, #tpu.memory_space<vmem>>, vector<84x128xf32>
    %cst_131 = arith.constant dense<0.000000e+00> : vector<1x128xf32>
    %149 = tpu.matmul %147, %148, %cst_131 {dimension_numbers = #tpu.dot_dimension_numbers<[1], [0], [0], [1], [0, 0, 1, 1], [], []>} : vector<1x84xf32>, vector<84x128xf32>, vector<1x128xf32> -> vector<1x128xf32>
    %c0_132 = arith.constant 0 : index
    %c0_133 = arith.constant 0 : index
    %150 = vector.load %arg15[%c0_132, %c0_133] : memref<1x128xf32, #tpu.memory_space<vmem>>, vector<1x128xf32>
    %151 = arith.addf %149, %150 : vector<1x128xf32>
    %c0_134 = arith.constant 0 : index
    %c0_135 = arith.constant 0 : index
    %c0_136 = arith.constant 0 : index
    %152 = vector.load %arg16[%c0_134, %c0_135, %c0_136] : memref<1x1x128xf32, #tpu.memory_space<vmem>>, vector<1x1x128xf32>
    %153 = vector.shape_cast %152 : vector<1x1x128xf32> to vector<1x128xf32>
    %154 = vector.shape_cast %151 : vector<1x128xf32> to vector<1x1x128xf32>
    tpu.vector_store %arg16[%c0_134, %c0_135, %c0_136], %154 {strides = array<i32>} : memref<1x1x128xf32, #tpu.memory_space<vmem>>, vector<1x1x128xf32>,
    return
  }
  func.func @transform_0(%arg0: i32) -> (i32, i32, i32, i32) {
    %c0_i32 = arith.constant 0 : i32
    %c0_i32_0 = arith.constant 0 : i32
    %c0_i32_1 = arith.constant 0 : i32
    %c0_i32_2 = arith.constant 0 : i32
    return %arg0, %c0_i32, %c0_i32_0, %c0_i32_1 : i32, i32, i32, i32
  }
  func.func @transform_1(%arg0: i32) -> (i32, i32, i32) {
    %c0_i32 = arith.constant 0 : i32
    %c0_i32_0 = arith.constant 0 : i32
    %c0_i32_1 = arith.constant 0 : i32
    %c0_i32_2 = arith.constant 0 : i32
    return %c0_i32, %c0_i32_0, %c0_i32_1 : i32, i32, i32
  }
  func.func @transform_2(%arg0: i32) -> (i32, i32, i32) {
    %c0_i32 = arith.constant 0 : i32
    %c0_i32_0 = arith.constant 0 : i32
    %c0_i32_1 = arith.constant 0 : i32
    %c0_i32_2 = arith.constant 0 : i32
    return %c0_i32, %c0_i32_0, %c0_i32_1 : i32, i32, i32
  }
  func.func @transform_3(%arg0: i32) -> (i32, i32) {
    %c0_i32 = arith.constant 0 : i32
    %c0_i32_0 = arith.constant 0 : i32
    %c0_i32_1 = arith.constant 0 : i32
    return %c0_i32, %c0_i32_0 : i32, i32
  }
  func.func @transform_4(%arg0: i32) -> (i32, i32, i32) {
    %c0_i32 = arith.constant 0 : i32
    %c0_i32_0 = arith.constant 0 : i32
    %c0_i32_1 = arith.constant 0 : i32
    %c0_i32_2 = arith.constant 0 : i32
    return %c0_i32, %c0_i32_0, %c0_i32_1 : i32, i32, i32
  }
  func.func @transform_5(%arg0: i32) -> (i32, i32, i32) {
    %c0_i32 = arith.constant 0 : i32
    %c0_i32_0 = arith.constant 0 : i32
    %c0_i32_1 = arith.constant 0 : i32
    %c0_i32_2 = arith.constant 0 : i32
    return %c0_i32, %c0_i32_0, %c0_i32_1 : i32, i32, i32
  }
  func.func @transform_6(%arg0: i32) -> (i32, i32, i32) {
    %c0_i32 = arith.constant 0 : i32
    %c0_i32_0 = arith.constant 0 : i32
    %c0_i32_1 = arith.constant 0 : i32
    %c0_i32_2 = arith.constant 0 : i32
    return %c0_i32, %c0_i32_0, %c0_i32_1 : i32, i32, i32
  }
  func.func @transform_7(%arg0: i32) -> (i32, i32) {
    %c0_i32 = arith.constant 0 : i32
    %c0_i32_0 = arith.constant 0 : i32
    %c0_i32_1 = arith.constant 0 : i32
    return %c0_i32, %c0_i32_0 : i32, i32
  }
  func.func @transform_8(%arg0: i32) -> (i32, i32, i32) {
    %c0_i32 = arith.constant 0 : i32
    %c0_i32_0 = arith.constant 0 : i32
    %c0_i32_1 = arith.constant 0 : i32
    %c0_i32_2 = arith.constant 0 : i32
    return %c0_i32, %c0_i32_0, %c0_i32_1 : i32, i32, i32
  }
  func.func @transform_9(%arg0: i32) -> (i32, i32, i32) {
    %c0_i32 = arith.constant 0 : i32
    %c0_i32_0 = arith.constant 0 : i32
    %c0_i32_1 = arith.constant 0 : i32
    %c0_i32_2 = arith.constant 0 : i32
    return %c0_i32, %c0_i32_0, %c0_i32_1 : i32, i32, i32
  }
  func.func @transform_10(%arg0: i32) -> (i32, i32) {
    %c0_i32 = arith.constant 0 : i32
    %c0_i32_0 = arith.constant 0 : i32
    %c0_i32_1 = arith.constant 0 : i32
    return %c0_i32, %c0_i32_0 : i32, i32
  }
  func.func @transform_11(%arg0: i32) -> (i32, i32) {
    %c0_i32 = arith.constant 0 : i32
    %c0_i32_0 = arith.constant 0 : i32
    %c0_i32_1 = arith.constant 0 : i32
    return %c0_i32, %c0_i32_0 : i32, i32
  }
  func.func @transform_12(%arg0: i32) -> (i32, i32) {
    %c0_i32 = arith.constant 0 : i32
    %c0_i32_0 = arith.constant 0 : i32
    %c0_i32_1 = arith.constant 0 : i32
    return %c0_i32, %c0_i32_0 : i32, i32
  }
  func.func @transform_13(%arg0: i32) -> (i32, i32) {
    %c0_i32 = arith.constant 0 : i32
    %c0_i32_0 = arith.constant 0 : i32
    %c0_i32_1 = arith.constant 0 : i32
    return %c0_i32, %c0_i32_0 : i32, i32
  }
  func.func @transform_14(%arg0: i32) -> (i32, i32) {
    %c0_i32 = arith.constant 0 : i32
    %c0_i32_0 = arith.constant 0 : i32
    %c0_i32_1 = arith.constant 0 : i32
    return %c0_i32, %c0_i32_0 : i32, i32
  }
  func.func @transform_15(%arg0: i32) -> (i32, i32, i32) {
    %c0_i32 = arith.constant 0 : i32
    %c0_i32_0 = arith.constant 0 : i32
    %c0_i32_1 = arith.constant 0 : i32
    return %arg0, %c0_i32, %c0_i32_0 : i32, i32, i32
  }
}

</mosaic_0001>

<bundles_post_ra>
// kernel: cnn_small_forward.1
= control target key start
LH: loop header
LB: loop body
LE: loop exit
PB: predicated region body
PF: predicated region fallthrough
CT: control target
= control target key end

     0   :  { %20 = vsyncpa [#allocation3], 0  ;;  %s5955_s0 = inlined_call_operand.vmem [shape: f32[2,1,32,32], index: 0, kind: input, shape index: {}]   ;;  %s5956_s1 = inlined_call_operand.vmem [shape: f32[5,32,84], index: 1, kind: input, shape index: {}]   ;;  %s5957_s2 = inlined_call_operand.vmem [shape: f32[5,32,84], index: 2, kind: input, shape index: {}]   ;;  %s5958_s3 = inlined_call_operand.vmem [shape: f32[1,84], index: 3, kind: input, shape index: {}]   ;;  %s5959_s4 = inlined_call_operand.vmem [shape: f32[2,14,28], index: 4, kind: input, shape index: {}]   ;;  %s5960_s5 = inlined_call_operand.vmem [shape: f32[5,84,80], index: 5, kind: input, shape index: {}]   ;;  %s5961_s6 = inlined_call_operand.vmem [shape: f32[5,84,80], index: 6, kind: input, shape index: {}]   ;;  %s5962_s7 = inlined_call_operand.vmem [shape: f32[1,80], index: 7, kind: input, shape index: {}]   ;;  %s5963_s8 = inlined_call_operand.vmem [shape: f32[2,5,10], index: 8, kind: input, shape index: {}]   ;;  %s5964_s9 = inlined_call_operand.vmem [shape: f32[5,80,120], index: 9, kind: input, shape index: {}]   ;;  %s5965_s10 = inlined_call_operand.vmem [shape: f32[1,120], index: 10, kind: input, shape index: {}]   ;;  %s5966_s11 = inlined_call_operand.vmem [shape: f32[120,84], index: 11, kind: input, shape index: {}]   ;;  %s5967_s12 = inlined_call_operand.vmem [shape: f32[1,84], index: 12, kind: input, shape index: {}]   ;;  %s5968_s13 = inlined_call_operand.vmem [shape: f32[84,128], index: 13, kind: input, shape index: {}]   ;;  %s5969_s14 = inlined_call_operand.vmem [shape: f32[1,128], index: 14, kind: input, shape index: {}]   ;;  %s5970_s15 = inlined_call_operand.hbm [shape: f32[2,1,128], index: 15, kind: output, shape index: {}]  }
   0x1   :  { %22 = vsyncpa [#allocation3 + $0x1], 0  ;;  %s4833_s18 = smov 0   ;;  %s4835_s19 = smov 0  }
   0x2   :  { %s4837_s20 = smov 0   ;;  %s4839_s21 = smov 0  }
   0x3 LB: > { %5976 = sst [smem:[#allocation5_spill]] %s4736_s18  ;;  %s4854_s22 = sadd.s32 4294967295, %s4748_s21   ;;  %s4748_s21 = sphi %s4839_s21, %s5985_s21   ;;  %s4744_s20 = sphi %s4837_s20, %s5987_s20   ;;  %s4740_s19 = sphi %s4835_s19, %s5989_s19   ;;  %s4736_s18 = sphi %s4833_s18, %s5988_s18  }
   0x4   : > { %5977 = sst [smem:[#allocation6_spill]] %s4744_s20  ;;  %s3474_s23 = sadd.s32 4294967294, %s4748_s21  }
   0x5   : > { %s4858_s24 = sadd.s32 1, %s4748_s21   ;;  %s355_s25 = sadd.s32 1, %s4744_s20 }
   0x6   : > { %5978 = sst [smem:[#allocation7_spill]] %s4858_s24  ;;  %s352_s26 = ssub.s32 %s4748_s21, %s4858_s24 }
   0x7   : > { %p365_p0 = scmp.ne.s32.totalorder %s4744_s20, %s4740_s19  ;;  %p353_p1 = scmp.eq.s32.totalorder %s352_s26, 0 }
   0x8   : > { %p366_p2 = scmp.eq.s32.totalorder %s4854_s22, 1  ;;  %p371_p3 = scmp.ne.s32.totalorder %s4740_s19, %s4736_s18 }
   0x9   : > { %p372_p4 = scmp.eq.s32.totalorder %s3474_s23, 1  ;;  %p3477_p7 = scmp.ge.s32.totalorder %s4748_s21, 1 }
   0xa   : > { %s4869_s27 = scalar_select %p353_p1, %s4744_s20, %s355_s25  }
   0xb   : > { %p4871_p5 = por %p366_p2, %p365_p0  ;;  %p4875_p6 = por %p372_p4, %p371_p3 }
   0xc   : > { %5979 = sst [smem:[#allocation8_spill]] %s4869_s27  ;;  %p440_p8 = scmp.lt.s32.totalorder %s4748_s21, 3 }
   0xd   : > { %s5981_s29 = scalar_select %p4875_p6, 1, 0 }
   0xe   : > { %p441_p9 = pnand %p3477_p7, %p440_p8 }
   0xf   : > { %5982 = sst [smem:[#allocation9_spill]] %s5981_s29  ;;  %p487_p10 = scmp.lt.s32.totalorder (!%p441_p9), %s4854_s22, 1 }
  0x10   : > { %444 = sbr.rel (%p441_p9) target bundleno = 1638 (0x666), region = 80  ;;  %s485_s25 = sand.u32 (!%p441_p9), 1, %s4740_s19  }
  0x11   : > { %s3733_s27 = sshll.u32 (!%p441_p9), %s4854_s22, 4  ;;  %s486_s30 = scalar_lea.vmem (!%p441_p9), [#allocation2], %s485_s25 }
  0x12   : > { %s5920_s18 = scalar_lea.hbm (!%p441_p9), %s5970_s15, %s3733_s27  ;;  %s3407_s29 = scalar_lea.sflag (!%p441_p9), [#allocation3], %s485_s25 }
  0x13   : > { %s4752_s26 = smov (!%p441_p9), [#allocation2]  }
  0x15   : > { %v499_v0 = vld [vmem:[%s5956_s1 + $0x18] sm:$0xff]  ;;  %v498_v2 = vld [vmem:[%s5956_s1 + $0x10] sm:$0xff]  ;;  %v497_v4 = vld [vmem:[%s5956_s1 + $0x8] sm:$0xff]  ;;  %s488_s23 = scalar_select %p487_p10, %s4854_s22, 1  ;;  %vm521_vm0 = vcmask 261120   ;;  %vm513_vm1 = vcmask 1046528  }
  0x16   : > { %v3483_v1 = vld [vmem:[%s5956_s1 + $0x38] sm:$0xff]  ;;  %4076 = vmatprep.subr.mxu0 %v499_v0  ;;  %v3482_v3 = vld [vmem:[%s5956_s1 + $0x30] sm:$0xff]  ;;  %v3481_v5 = vld [vmem:[%s5956_s1 + $0x28] sm:$0xff]  ;;  %vm888_vm2 = vcmask 1045504   ;;  %vm1092_vm3 = vcmask 1044480   ;;  %vm1296_vm4 = vcmask 1043456  }
  0x17   : > { %4048 = vmatprep.subr.mxu1 %v3483_v1  ;;  %4077 = vmatpush3.msra.mxu0 %v499_v0  ;;  %v496_v6 = vld [vmem:[%s5956_s1] sm:$0xff]  ;;  %s3736_s20 = sshll.u32 %s488_s23, 5  ;;  %v3507_v8 = vld [vmem:[%s5956_s1 + $0x58] sm:$0xff]  ;;  %v3506_v19 = vld [vmem:[%s5956_s1 + $0x50] sm:$0xff]  ;;  %vm1516_vm5 = vcmask 228352   ;;  %vm1726_vm6 = vcmask 687104  }
  0x18   : > { %4049 = vmatpush3.msra.mxu1 %v3483_v1  ;;  %4078 = vmatprep.subr.mxu0 %v498_v2  ;;  %s491_s16 = scalar_lea.vmem %s5955_s0, %s3736_s20  ;;  %v3480_v7 = vld [vmem:[%s5956_s1 + $0x20] sm:$0xff]  ;;  %v3491_v18 = vld [vmem:[%s5957_s2 + $0x38] sm:$0xff]  ;;  %v3490_v21 = vld [vmem:[%s5957_s2 + $0x30] sm:$0xff]  ;;  %vm4751_vm7 = vmmov 0   ;;  %vm2650_vm8 = vcmask 1041408   ;;  %vm2646_vm9 = vcmask 80896  }
  0x19   : > { %4050 = vmatprep.subr.mxu1 %v3482_v3  ;;  %4079 = vmatpush3.msra.mxu0 %v498_v2  ;;  %v4913_v9 = vld [vmem:[%s491_s16] sm:$0xff]  ;;  %v4915_v10 = vld [vmem:[%s491_s16 + $0x10] sm:$0xff]  ;;  %v4917_v11 = vld [vmem:[%s491_s16 + $0x8] sm:$0xff]  ;;  %vm2823_vm10 = vcmask 654336   ;;  %vm3242_vm11 = vcmask 982016   ;;  %s4692_s22 = sshll.u32 %s4752_s26, 4  ;;  %s4693_s22 = int_to_ptr.vmem [resolvable:$false] %s4692_s22 }
  0x1a   : > { %4051 = vmatpush3.msra.mxu1 %v3482_v3  ;;  %4080 = vmatprep.subr.mxu0 %v497_v4  ;;  %v514_v12 = vrot.slane %v4913_v9, 1  ;;  %v515_v13 = vrot.slane %v4917_v11, 1  ;;  %v517_v14 = vrot.slane %v4915_v10, 1  ;;  %v4924_v15 = vld [vmem:[%s491_s16 + $0x18] sm:$0xff]  ;;  %v3505_v22 = vld [vmem:[%s5956_s1 + $0x48] sm:$0xff]  ;;  %v889_v24 = vrot.slane %v4913_v9, 2 }
  0x1b   : > { %4052 = vmatprep.subr.mxu1 %v3481_v5  ;;  %4081 = vmatpush3.msra.mxu0 %v497_v4  ;;  %v4937_v20 = vrot.slane %v4924_v15, 1  ;;  %v890_v25 = vrot.slane %v4917_v11, 2  ;;  %v892_v26 = vrot.slane %v4915_v10, 2  ;;  %v3489_v27 = vld [vmem:[%s5957_s2 + $0x28] sm:$0xff]  ;;  %v3504_v28 = vld [vmem:[%s5956_s1 + $0x40] sm:$0xff]  ;;  %v3523_v32 = vld [vmem:[%s5956_s1 + $0x78] sm:$0xff] }
  0x1c   : > { %4053 = vmatpush3.msra.mxu1 %v3481_v5  ;;  %4082 = vmatprep.subr.mxu0 %v496_v6  ;;  %v516_v16 = vsel %vm513_vm1, %v514_v12, %v515_v13  ;;  %v518_v17 = vsel %vm513_vm1, %v515_v13, %v517_v14  ;;  %v3488_v30 = vld [vmem:[%s5957_s2 + $0x20] sm:$0xff]  ;;  %v4978_v33 = vrot.slane %v4924_v15, 2  ;;  %v503_v34 = vld [vmem:[%s5957_s2 + $0x18] sm:$0xff]  ;;  %v3522_v35 = vld [vmem:[%s5956_s1 + $0x70] sm:$0xff]  ;;  %v1093_v39 = vrot.slane %v4913_v9, 3  ;;  %s3419_s16 = sshll.u32 %s486_s30, 4  ;;  %s3420_s16 = int_to_ptr.vmem [resolvable:$true] %s3419_s16 }
  0x1d   : > { %4084 = vmatprep.mubr.msk.f32.mxu0 %vm521_vm0, %v4913_v9  ;;  %4083 = vmatpush3.msra.mxu0 %v496_v6  ;;  %v520_v23 = vsel %vm513_vm1, %v517_v14, %v4937_v20  ;;  %v4966_v29 = vsel %vm888_vm2, %v889_v24, %v890_v25  ;;  %v4972_v31 = vsel %vm888_vm2, %v890_v25, %v892_v26  ;;  %v502_v37 = vld [vmem:[%s5957_s2 + $0x10] sm:$0xff]  ;;  %v3521_v38 = vld [vmem:[%s5956_s1 + $0x68] sm:$0xff]  ;;  %v1094_v40 = vrot.slane %v4917_v11, 3  ;;  %v3520_v43 = vld [vmem:[%s5956_s1 + $0x60] sm:$0xff]  ;;  %s4688_s23 = scalar_lea.vmem %s3420_s16, 16  ;;  %s4694_s20 = scalar_lea.vmem %s4693_s22, 32 }
  0x1e   : > { %4054 = vmatprep.subr.mxu1 %v3480_v7  ;;  %4085 = vmatmul.mubr.msk.f32.vlgmr.msra.gmra.mxu0 %vm521_vm0, %v4917_v11  ;;  %v4993_v36 = vsel %vm888_vm2, %v892_v26, %v4978_v33  ;;  %v1096_v41 = vrot.slane %v4915_v10, 3  ;;  %v501_v42 = vld [vmem:[%s5957_s2 + $0x8] sm:$0xff]  ;;  %v500_v45 = vld [vmem:[%s5957_s2] sm:$0xff]  ;;  %v3539_v47 = vld [vmem:[%s5956_s1 + $0x98] sm:$0xff]  ;;  %v5031_v48 = vrot.slane %v4924_v15, 3  ;;  %v1297_v54 = vrot.slane %v4913_v9, 4  ;;  %p4689_p11 = scmp.ne.s32.totalorder %s3420_s16, %s4688_s23  ;;  %p4695_p0 = scmp.lt.s32.totalorder %s3420_s16, %s4693_s22 }
  0x1f   : > { %4104 = vmatprep.subr.mxu0 %v3507_v8  ;;  %4055 = vmatpush3.msra.mxu1 %v3480_v7  ;;  %v5019_v44 = vsel %vm1092_vm3, %v1093_v39, %v1094_v40  ;;  %v3515_v49 = vld [vmem:[%s5957_s2 + $0x58] sm:$0xff]  ;;  %v3538_v50 = vld [vmem:[%s5956_s1 + $0x90] sm:$0xff]  ;;  %v3537_v53 = vld [vmem:[%s5956_s1 + $0x88] sm:$0xff]  ;;  %v1298_v55 = vrot.slane %v4917_v11, 4  ;;  %v1300_v56 = vrot.slane %v4915_v10, 4  ;;  %v1302_v59 = vrot.slane %v4924_v15, 4  ;;  %p4696_p1 = scmp.lt.s32.totalorder %s4694_s20, %s4688_s23 }
  0x20   : > { %4056 = vmatprep.mubr.msk.f32.mxu1 %vm521_vm0, %v516_v16  ;;  %4105 = vmatpush3.msra.mxu0 %v3507_v8  ;;  %v5025_v46 = vsel %vm1092_vm3, %v1094_v40, %v1096_v41  ;;  %v1099_v51 = vsel %vm1092_vm3, %v1096_v41, %v5031_v48  ;;  %v3514_v52 = vld [vmem:[%s5957_s2 + $0x50] sm:$0xff]  ;;  %v3513_v57 = vld [vmem:[%s5957_s2 + $0x48] sm:$0xff]  ;;  %v3536_v58 = vld [vmem:[%s5956_s1 + $0x80] sm:$0xff]  ;;  %p4690_p12 = pnand %p4689_p11, %p4871_p5 }
  0x21   : > { %4057 = vmatmul.mubr.msk.f32.vlgmr.msra.gmra.mxu1 %vm521_vm0, %v518_v17  ;;  %4062 = vmatprep.subr.mxu1 %v3491_v18  ;;  %v1299_v60 = vsel %vm1296_vm4, %v1297_v54, %v1298_v55  ;;  %v3512_v61 = vld [vmem:[%s5957_s2 + $0x40] sm:$0xff]  ;;  %v1301_v62 = vsel %vm1296_vm4, %v1298_v55, %v1300_v56  ;;  %v3531_v63 = vld [vmem:[%s5957_s2 + $0x78] sm:$0xff]  ;;  %v1303_v0 = vsel %vm1296_vm4, %v1300_v56, %v1302_v59  ;;  %v3530_v1 = vld [vmem:[%s5957_s2 + $0x70] sm:$0xff]  ;;  %p4697_p2 = por %p4696_p1, %p4695_p0 }
  0x22   : > { %4106 = vmatprep.subr.mxu0 %v3506_v19  ;;  %4063 = vmatpush3.msra.mxu1 %v3491_v18  ;;  %v3529_v2 = vld [vmem:[%s5957_s2 + $0x68] sm:$0xff]  ;;  %v3528_v3 = vld [vmem:[%s5957_s2 + $0x60] sm:$0xff]  ;;  %v3547_v4 = vld [vmem:[%s5957_s2 + $0x98] sm:$0xff]  ;;  %p4691_p13 = pneg %p4690_p12 }
  0x23   : > { %4087 = vmatprep.mubr.msk.f32.mxu0 %vm521_vm0, %v4915_v10  ;;  %4107 = vmatpush3.msra.mxu0 %v3506_v19  ;;  %v3546_v5 = vld [vmem:[%s5957_s2 + $0x90] sm:$0xff]  ;;  %v3545_v6 = vld [vmem:[%s5957_s2 + $0x88] sm:$0xff]  ;;  %v3544_v7 = vld [vmem:[%s5957_s2 + $0x80] sm:$0xff] }
  0x24   : > { %4064 = vmatprep.subr.mxu1 %v3490_v21  ;;  %4088 = vmatmul.mubr.msk.f32.gmra.mxu0 %vm521_vm0, %v4924_v15  ;;  %v1514_v8 = vld [vmem:[%s5959_s4] sm:$0xff]  ;;  %p4698_p3 = pnand %p4697_p2, %p4691_p13 }
  0x25   : > { %4108 = vmatprep.subr.mxu0 %v3505_v22  ;;  %4059 = vmatprep.mubr.msk.f32.mxu1 %vm521_vm0, %v520_v23 }
  0x26   : > { %4065 = vmatpush3.msra.mxu1 %v3490_v21  ;;  %4109 = vmatpush3.msra.mxu0 %v3505_v22 }
  0x27   : > { %4060 = vmatmul.mubr.msk.f32.gmra.mxu1 %vm521_vm0, %v4937_v20  ;;  %4066 = vmatprep.subr.mxu1 %v3489_v27 }
  0x28   : > { %4110 = vmatprep.subr.mxu0 %v3504_v28  ;;  %4067 = vmatpush3.msra.mxu1 %v3489_v27 }
  0x29   : > { %4111 = vmatpush3.msra.mxu0 %v3504_v28  ;;  %4112 = vmatprep.mubr.msk.f32.mxu0 %vm521_vm0, %v4966_v29 }
  0x2a   : > { %4068 = vmatprep.subr.mxu1 %v3488_v30  ;;  %4113 = vmatmul.mubr.msk.f32.vlgmr.msra.gmra.mxu0 %vm521_vm0, %v4972_v31 }
  0x2b   : > { %4132 = vmatprep.subr.mxu0 %v3523_v32  ;;  %4069 = vmatpush3.msra.mxu1 %v3488_v30 }
  0x2c   : > { %4070 = vmatprep.mubr.msk.f32.mxu1 %vm521_vm0, %v516_v16  ;;  %4133 = vmatpush3.msra.mxu0 %v3523_v32 }
  0x2d   : > { %4071 = vmatmul.mubr.msk.f32.vlgmr.msra.gmra.mxu1 %vm521_vm0, %v518_v17  ;;  %4090 = vmatprep.subr.mxu1 %v503_v34 }
  0x2e   : > { %4134 = vmatprep.subr.mxu0 %v3522_v35  ;;  %4091 = vmatpush3.msra.mxu1 %v503_v34 }
  0x2f   : > { %4115 = vmatprep.mubr.msk.f32.mxu0 %vm521_vm0, %v4993_v36  ;;  %4135 = vmatpush3.msra.mxu0 %v3522_v35 }
  0x30   : > { %4092 = vmatprep.subr.mxu1 %v502_v37  ;;  %4116 = vmatmul.mubr.msk.f32.gmra.mxu0 %vm521_vm0, %v4978_v33 }
  0x31   : > { %4136 = vmatprep.subr.mxu0 %v3521_v38  ;;  %4073 = vmatprep.mubr.msk.f32.mxu1 %vm521_vm0, %v520_v23 }
  0x32   : > { %4093 = vmatpush3.msra.mxu1 %v502_v37  ;;  %4137 = vmatpush3.msra.mxu0 %v3521_v38 }
  0x33   : > { %4074 = vmatmul.mubr.msk.f32.gmra.mxu1 %vm521_vm0, %v4937_v20  ;;  %4094 = vmatprep.subr.mxu1 %v501_v42 }
  0x34   : > { %4138 = vmatprep.subr.mxu0 %v3520_v43  ;;  %4095 = vmatpush3.msra.mxu1 %v501_v42 }
  0x35   : > { %4139 = vmatpush3.msra.mxu0 %v3520_v43  ;;  %4140 = vmatprep.mubr.msk.f32.mxu0 %vm521_vm0, %v5019_v44 }
  0x36   : > { %4096 = vmatprep.subr.mxu1 %v500_v45  ;;  %4141 = vmatmul.mubr.msk.f32.vlgmr.msra.gmra.mxu0 %vm521_vm0, %v5025_v46 }
  0x37   : > { %4160 = vmatprep.subr.mxu0 %v3539_v47  ;;  %4097 = vmatpush3.msra.mxu1 %v500_v45 }
  0x38   : > { %4098 = vmatprep.mubr.msk.f32.mxu1 %vm521_vm0, %v4913_v9  ;;  %4161 = vmatpush3.msra.mxu0 %v3539_v47  ;;  %v3556_v9 = vld [vmem:[%s5959_s4 + $0x10] sm:$0xff] }
  0x39   : > { %4099 = vmatmul.mubr.msk.f32.vlgmr.msra.gmra.mxu1 %vm521_vm0, %v4917_v11  ;;  %4118 = vmatprep.subr.mxu1 %v3515_v49 }
  0x3a   : > { %4162 = vmatprep.subr.mxu0 %v3538_v50  ;;  %4119 = vmatpush3.msra.mxu1 %v3515_v49 }
  0x3b   : > { %4143 = vmatprep.mubr.msk.f32.mxu0 %vm521_vm0, %v1099_v51  ;;  %4163 = vmatpush3.msra.mxu0 %v3538_v50 }
  0x3c   : > { %4120 = vmatprep.subr.mxu1 %v3514_v52  ;;  %4144 = vmatmul.mubr.msk.f32.gmra.mxu0 %vm521_vm0, %v5031_v48 }
  0x3d   : > { %4164 = vmatprep.subr.mxu0 %v3537_v53  ;;  %4101 = vmatprep.mubr.msk.f32.mxu1 %vm521_vm0, %v4915_v10 }
  0x3e   : > { %4121 = vmatpush3.msra.mxu1 %v3514_v52  ;;  %4165 = vmatpush3.msra.mxu0 %v3537_v53 }
  0x3f   : > { %4102 = vmatmul.mubr.msk.f32.gmra.mxu1 %vm521_vm0, %v4924_v15  ;;  %4122 = vmatprep.subr.mxu1 %v3513_v57 }
  0x40   : > { %4166 = vmatprep.subr.mxu0 %v3536_v58  ;;  %4123 = vmatpush3.msra.mxu1 %v3513_v57 }
  0x41   : > { %4167 = vmatpush3.msra.mxu0 %v3536_v58  ;;  %4168 = vmatprep.mubr.msk.f32.mxu0 %vm521_vm0, %v1299_v60 }
  0x42   : > { %4124 = vmatprep.subr.mxu1 %v3512_v61  ;;  %4169 = vmatmul.mubr.msk.f32.vlgmr.msra.gmra.mxu0 %vm521_vm0, %v1301_v62 }
  0x43   : > { %4125 = vmatpush3.msra.mxu1 %v3512_v61  ;;  %4126 = vmatprep.mubr.msk.f32.mxu1 %vm521_vm0, %v4966_v29 }
  0x44   : > { %4146 = vmatprep.subr.mxu1 %v3531_v63  ;;  %4127 = vmatmul.mubr.msk.f32.vlgmr.msra.gmra.mxu1 %vm521_vm0, %v4972_v31 }
  0x45   : > { %4171 = vmatprep.mubr.msk.f32.mxu0 %vm521_vm0, %v1303_v0  ;;  %4147 = vmatpush3.msra.mxu1 %v3531_v63 }
  0x46   : > { %4129 = vmatprep.mubr.msk.f32.mxu1 %vm521_vm0, %v4993_v36  ;;  %4148 = vmatprep.subr.mxu1 %v3530_v1 }
  0x47   : > { %4172 = vmatmul.mubr.msk.f32.gmra.mxu0 %vm521_vm0, %v1302_v59  ;;  %4149 = vmatpush3.msra.mxu1 %v3530_v1 }
  0x48   : > { %4130 = vmatmul.mubr.msk.f32.gmra.mxu1 %vm521_vm0, %v4978_v33  ;;  %4150 = vmatprep.subr.mxu1 %v3529_v2 }
  0x49   : > { %4151 = vmatpush3.msra.mxu1 %v3529_v2  ;;  %4154 = vmatprep.mubr.msk.f32.mxu1 %vm521_vm0, %v5019_v44 }
  0x4a   : > { %4152 = vmatprep.subr.mxu1 %v3528_v3  ;;  %4196 = vmatprep.mubr.msk.f32.mxu0 %vm1516_vm5, %v1514_v8 }
  0x4b   : > { %4153 = vmatpush3.msra.mxu1 %v3528_v3 }
  0x4c   : > { %4155 = vmatmul.mubr.msk.f32.vlgmr.msra.gmra.mxu1 %vm521_vm0, %v5025_v46  ;;  %4174 = vmatprep.subr.mxu1 %v3547_v4 }
  0x4d   : > { %4175 = vmatpush3.msra.mxu1 %v3547_v4  ;;  %4157 = vmatprep.mubr.msk.f32.mxu1 %vm521_vm0, %v1099_v51 }
  0x4e   : > { %4176 = vmatprep.subr.mxu1 %v3546_v5 }
  0x4f   : > { %4177 = vmatpush3.msra.mxu1 %v3546_v5 }
  0x50   : > { %4158 = vmatmul.mubr.msk.f32.gmra.mxu1 %vm521_vm0, %v5031_v48  ;;  %4178 = vmatprep.subr.mxu1 %v3545_v6 }
  0x51   : > { %4179 = vmatpush3.msra.mxu1 %v3545_v6  ;;  %4182 = vmatprep.mubr.msk.f32.mxu1 %vm521_vm0, %v1299_v60 }
  0x52   : > { %4180 = vmatprep.subr.mxu1 %v3544_v7 }
  0x53   : > { %4181 = vmatpush3.msra.mxu1 %v3544_v7 }
  0x54   : > { %4183 = vmatmul.mubr.msk.f32.vlgmr.msra.gmra.mxu1 %vm521_vm0, %v1301_v62 }
  0x55   : > { %4185 = vmatprep.mubr.msk.f32.mxu1 %vm521_vm0, %v1303_v0 }
  0x58   : > { %4186 = vmatmul.mubr.msk.f32.gmra.mxu1 %vm521_vm0, %v1302_v59 }
  0x59   : > { %4207 = vmatprep.mubr.msk.f32.mxu1 %vm1516_vm5, %v3556_v9 }
  0xde   : > { %v4086_v10 = vpop.f32.mrf.mxu0 }
  0xe0   : > { %v779_v12 = vpop.f32.mrf.mxu0 }
  0xe1   : > { %v4058_v11 = vpop.f32.mrf.mxu1 }
  0xe2   : > { %v785_v44 = vadd.f32 %v4086_v10, %v4058_v11 }
  0xe3   : > { %v596_v13 = vpop.f32.mrf.mxu1 }
  0xe4   : > { %v4089_v14 = vpop.f32.mrf.mxu0  ;;  %v780_v50 = vadd.f32 %v779_v12, %v596_v13 }
  0xe6   : > { %v789_v16 = vpop.f32.mrf.mxu0 }
  0xe7   : > { %v4061_v15 = vpop.f32.mrf.mxu1 }
  0xe8   : > { %v795_v45 = vadd.f32 %v4089_v14, %v4061_v15 }
  0xe9   : > { %v606_v17 = vpop.f32.mrf.mxu1 }
  0xea   : > { %v4114_v18 = vpop.f32.mrf.mxu0  ;;  %v790_v51 = vadd.f32 %v789_v16, %v606_v17 }
  0xeb   : > { %v1080_v52 = vadd.f32 %v4114_v18, %v785_v44  ;;  %v3580_v44 = vld [vmem:[%s5961_s6 + $0x80] sm:$0xff] }
  0xec   : > { %v970_v21 = vpop.f32.mrf.mxu0 }
  0xed   : > { %v4072_v19 = vpop.f32.mrf.mxu1  ;;  %v1079_v60 = vadd.f32 %v970_v21, %v780_v50  ;;  %v3577_v50 = vld [vmem:[%s5961_s6 + $0x68] sm:$0xff] }
  0xef   : > { %v686_v20 = vpop.f32.mrf.mxu1 }
  0xf0   : > { %v4117_v23 = vpop.f32.mrf.mxu0 }
  0xf1   : > { %v1082_v53 = vadd.f32 %v4117_v23, %v795_v45  ;;  %v3565_v45 = vld [vmem:[%s5960_s5 + $0x78] sm:$0xff] }
  0xf2   : > { %v980_v25 = vpop.f32.mrf.mxu0 }
  0xf3   : > { %v4075_v22 = vpop.f32.mrf.mxu1  ;;  %v1081_v61 = vadd.f32 %v980_v25, %v790_v51  ;;  %v3562_v51 = vld [vmem:[%s5960_s5 + $0x60] sm:$0xff] }
  0xf5   : > { %v696_v24 = vpop.f32.mrf.mxu1 }
  0xf6   : > { %v4142_v28 = vpop.f32.mrf.mxu0 }
  0xf7   : > { %v1284_v62 = vadd.f32 %v4142_v28, %v1080_v52  ;;  %v3576_v52 = vld [vmem:[%s5961_s6 + $0x60] sm:$0xff] }
  0xf8   : > { %v1174_v30 = vpop.f32.mrf.mxu0 }
  0xf9   : > { %v4100_v26 = vpop.f32.mrf.mxu1  ;;  %v1283_v5 = vadd.f32 %v1174_v30, %v1079_v60 }
  0xfa   : > { %v870_v43 = vadd.f32 %v4100_v26, %v4072_v19 }
  0xfb   : > { %v864_v27 = vpop.f32.mrf.mxu1 }
  0xfc   : > { %v4145_v32 = vpop.f32.mrf.mxu0  ;;  %v865_v47 = vadd.f32 %v864_v27, %v686_v20  ;;  %v3552_v20 = vld [vmem:[%s5958_s3] ss:$0 sm:$0xff] }
  0xfd   : > { %v1286_v63 = vadd.f32 %v4145_v32, %v1082_v53  ;;  %v3557_v32 = vld [vmem:[%s5959_s4 + $0x18] sm:$0x3f] }
  0xfe   : > { %v1184_v35 = vpop.f32.mrf.mxu0  ;;  %v3561_v53 = vld [vmem:[%s5960_s5 + $0x58] sm:$0xff] }
  0xff   : > { %v4103_v29 = vpop.f32.mrf.mxu1  ;;  %v1285_v6 = vadd.f32 %v1184_v35, %v1081_v61  ;;  %v3570_v35 = vld [vmem:[%s5960_s5 + $0xa0] sm:$0xff] }
 0x100   : > { %v880_v48 = vadd.f32 %v4103_v29, %v4075_v22 }
 0x101   : > { %v874_v31 = vpop.f32.mrf.mxu1 }
 0x102   : > { %v4170_v38 = vpop.f32.mrf.mxu0  ;;  %v875_v56 = vadd.f32 %v874_v31, %v696_v24  ;;  %v1515_v31 = vld [vmem:[%s5959_s4 + $0x8] sm:$0x3f] }
 0x103   : > { %v1488_v7 = vadd.f32 %v4170_v38, %v1284_v62  ;;  %v3583_v38 = vld [vmem:[%s5961_s6 + $0x98] sm:$0xff] }
 0x104   : > { %v4128_v33 = vpop.f32.mrf.mxu1  ;;  %v1378_v41 = vpop.f32.mrf.mxu0 }
 0x105   : > { %v1084_v49 = vadd.f32 %v4128_v33, %v870_v43  ;;  %v1487_v14 = vadd.f32 %v1378_v41, %v1283_v5  ;;  %v3571_v33 = vld [vmem:[%s5960_s5 + $0xa8] sm:$0xf]  ;;  %v3566_v43 = vld [vmem:[%s5960_s5 + $0x80] sm:$0xff] }
 0x106   : > { %v1060_v34 = vpop.f32.mrf.mxu1  ;;  %v3567_v41 = vld [vmem:[%s5960_s5 + $0x88] sm:$0xff] }
 0x107   : > { %v4173_v54 = vpop.f32.mrf.mxu0  ;;  %v1083_v57 = vadd.f32 %v1060_v34, %v865_v47  ;;  %v3585_v34 = vld [vmem:[%s5961_s6 + $0xa8] sm:$0xf]  ;;  %v3564_v47 = vld [vmem:[%s5960_s5 + $0x70] sm:$0xff] }
 0x108   : > { %v4131_v36 = vpop.f32.mrf.mxu1  ;;  %v1490_v10 = vadd.f32 %v4173_v54, %v1286_v63  ;;  %v3575_v54 = vld [vmem:[%s5961_s6 + $0x58] sm:$0xff]  ;;  %v1696_v5 = vld [vmem:[%s5960_s5 + $0x48] sm:$0xff] }
 0x109   : > { %v1086_v58 = vadd.f32 %v4131_v36, %v880_v48  ;;  %v1388_v8 = vpop.f32.mrf.mxu0  ;;  %v3584_v36 = vld [vmem:[%s5961_s6 + $0xa0] sm:$0xff]  ;;  %v3578_v48 = vld [vmem:[%s5961_s6 + $0x70] sm:$0xff] }
 0x10a   : > { %v1070_v37 = vpop.f32.mrf.mxu1  ;;  %v1489_v16 = vadd.f32 %v1388_v8, %v1285_v6  ;;  %v1707_v6 = vld [vmem:[%s5961_s6 + $0x48] sm:$0xff]  ;;  %v1706_v8 = vld [vmem:[%s5961_s6 + $0x40] sm:$0xff] }
 0x10b   : > { %v1085_v1 = vadd.f32 %v1070_v37, %v875_v56  ;;  %v3569_v37 = vld [vmem:[%s5960_s5 + $0x98] sm:$0xff]  ;;  %v1708_v56 = vld [vmem:[%s5961_s6 + $0x50] sm:$0xf] }
 0x10c   : > { %v4156_v39 = vpop.f32.mrf.mxu1 }
 0x10d   : > { %v1288_v59 = vadd.f32 %v4156_v39, %v1084_v49  ;;  %v3568_v39 = vld [vmem:[%s5960_s5 + $0x90] sm:$0xff]  ;;  %v3563_v49 = vld [vmem:[%s5960_s5 + $0x68] sm:$0xff] }
 0x10e   : > { %v1264_v40 = vpop.f32.mrf.mxu1 }
 0x10f   : > { %v1287_v2 = vadd.f32 %v1264_v40, %v1083_v57  ;;  %v3582_v40 = vld [vmem:[%s5961_s6 + $0x90] sm:$0xff] }
 0x110   : > { %v4159_v42 = vpop.f32.mrf.mxu1 }
 0x111   : > { %v1290_v3 = vadd.f32 %v4159_v42, %v1086_v58  ;;  %v3581_v42 = vld [vmem:[%s5961_s6 + $0x88] sm:$0xff] }
 0x112   : > { %v1274_v46 = vpop.f32.mrf.mxu1 }
 0x113   : > { %v1289_v11 = vadd.f32 %v1274_v46, %v1085_v1  ;;  %v3579_v46 = vld [vmem:[%s5961_s6 + $0x78] sm:$0xff] }
 0x114   : > { %v4184_v55 = vpop.f32.mrf.mxu1 }
 0x115   : > { %v1492_v4 = vadd.f32 %v4184_v55, %v1288_v59  ;;  %v1697_v55 = vld [vmem:[%s5960_s5 + $0x50] sm:$0xf] }
 0x116   : > { %v1468_v0 = vpop.f32.mrf.mxu1 }
 0x117   : > { %v1491_v12 = vadd.f32 %v1468_v0, %v1287_v2  ;;  %v1496_v17 = vmax.f32 %v1488_v7, %v1492_v4  ;;  %v1695_v7 = vld [vmem:[%s5960_s5 + $0x40] sm:$0xff] }
 0x118   : > { %v4187_v9 = vpop.f32.mrf.mxu1 }
 0x119   : > { %v1494_v13 = vadd.f32 %v4187_v9, %v1290_v3  ;;  %v1495_v21 = vmax.f32 %v1487_v14, %v1491_v12  ;;  %v1507_v24 = vadd.f32 %v3552_v20, %v1496_v17  ;;  %v1694_v9 = vld [vmem:[%s5960_s5 + $0x38] sm:$0xff]  ;;  %v1704_v12 = vld [vmem:[%s5961_s6 + $0x30] sm:$0xff]  ;;  %v1703_v14 = vld [vmem:[%s5961_s6 + $0x28] sm:$0xff] }
 0x11a   : > { %v1478_v15 = vpop.f32.mrf.mxu1  ;;  %v1690_v17 = vld [vmem:[%s5960_s5 + $0x18] sm:$0xff] }
 0x11b   : > { %v1498_v18 = vmax.f32 %v1490_v10, %v1494_v13  ;;  %v1493_v19 = vadd.f32 %v1478_v15, %v1289_v11  ;;  %v1506_v27 = vadd.f32 %v3552_v20, %v1495_v21  ;;  %v1511_v29 = vmax.f32 %v1507_v24, 0.0  ;;  %v1705_v10 = vld [vmem:[%s5961_s6 + $0x38] sm:$0xff]  ;;  %v1693_v11 = vld [vmem:[%s5960_s5 + $0x30] sm:$0xff]  ;;  %v1692_v13 = vld [vmem:[%s5960_s5 + $0x28] sm:$0xff] }
 0x11c   : > { %v1691_v15 = vld [vmem:[%s5960_s5 + $0x20] sm:$0xff]  ;;  %v1688_v21 = vld [vmem:[%s5960_s5 + $0x8] sm:$0xff] }
 0x11d   : > { %v1509_v22 = vadd.f32 %v3552_v20, %v1498_v18  ;;  %v1497_v23 = vmax.f32 %v1489_v16, %v1493_v19  ;;  %v1510_v30 = vmax.f32 %v1506_v27, 0.0  ;;  %v1702_v16 = vld [vmem:[%s5961_s6 + $0x20] sm:$0xff]  ;;  %v1701_v18 = vld [vmem:[%s5961_s6 + $0x18] sm:$0xff]  ;;  %v1689_v19 = vld [vmem:[%s5960_s5 + $0x10] sm:$0xff] }
 0x11e   : > { %v1698_v24 = vld [vmem:[%s5961_s6] sm:$0xff] }
 0x11f   : > { %v1513_v25 = vmax.f32 %v1509_v22, 0.0  ;;  %v1508_v26 = vadd.f32 %v3552_v20, %v1497_v23  ;;  %v1700_v20 = vld [vmem:[%s5961_s6 + $0x10] sm:$0xff]  ;;  %v1699_v22 = vld [vmem:[%s5961_s6 + $0x8] sm:$0xff]  ;;  %v1687_v23 = vld [vmem:[%s5960_s5] sm:$0xff] }
 0x120   : > { %v3619_v27 = vld [vmem:[%s5961_s6 + $0x100] sm:$0xf] }
 0x121   : > { %v1512_v28 = vmax.f32 %v1508_v26, 0.0  ;;  %4188 = vmatprep.subr.msk.mxu0 %vm1296_vm4, %v1513_v25  ;;  %4199 = vmatprep.subr.msk.mxu1 %vm1296_vm4, %v1513_v25  ;;  %v3605_v26 = vld [vmem:[%s5960_s5 + $0x100] sm:$0xf] }
 0x122   : > { %4189 = vmatpush3.msk.msra.mxu0 %vm1296_vm4, %v1513_v25  ;;  %4200 = vmatpush3.msk.msra.mxu1 %vm1296_vm4, %v1513_v25 }
 0x123   : > { %4190 = vmatprep.subr.mxu0 %v1512_v28  ;;  %4201 = vmatprep.subr.mxu1 %v1512_v28 }
 0x124   : > { %4191 = vmatpush3.msra.mxu0 %v1512_v28  ;;  %4202 = vmatpush3.msra.mxu1 %v1512_v28 }
 0x125   : > { %4192 = vmatprep.subr.mxu0 %v1511_v29  ;;  %4203 = vmatprep.subr.mxu1 %v1511_v29 }
 0x126   : > { %4193 = vmatpush3.msra.mxu0 %v1511_v29  ;;  %4204 = vmatpush3.msra.mxu1 %v1511_v29 }
 0x127   : > { %4194 = vmatprep.subr.mxu0 %v1510_v30  ;;  %4205 = vmatprep.subr.mxu1 %v1510_v30 }
 0x128   : > { %4195 = vmatpush3.msra.mxu0 %v1510_v30  ;;  %4206 = vmatpush3.msra.mxu1 %v1510_v30  ;;  %v3604_v30 = vld [vmem:[%s5960_s5 + $0xf8] sm:$0xff] }
 0x129   : > { %4197 = vmatmul.mubr.msk.f32.vlgmr.msra.gmra.mxu0 %vm1516_vm5, %v1515_v31  ;;  %4208 = vmatmul.mubr.msk.f32.vlgmr.msra.gmra.mxu1 %vm1516_vm5, %v3557_v32  ;;  %v3618_v31 = vld [vmem:[%s5961_s6 + $0xf8] sm:$0xff]  ;;  %v3603_v32 = vld [vmem:[%s5960_s5 + $0xf0] sm:$0xff] }
 0x12a   : > { %4210 = vmatprep.subr.msk.mxu0 %vm1296_vm4, %v3571_v33  ;;  %4235 = vmatprep.subr.msk.mxu1 %vm1296_vm4, %v3585_v34 }
 0x12b   : > { %4211 = vmatpush3.msk.msra.mxu0 %vm1296_vm4, %v3571_v33  ;;  %4236 = vmatpush3.msk.msra.mxu1 %vm1296_vm4, %v3585_v34  ;;  %v3617_v33 = vld [vmem:[%s5961_s6 + $0xf0] sm:$0xff]  ;;  %v3602_v34 = vld [vmem:[%s5960_s5 + $0xe8] sm:$0xff] }
 0x12c   : > { %4212 = vmatprep.subr.mxu0 %v3570_v35  ;;  %4237 = vmatprep.subr.mxu1 %v3584_v36 }
 0x12d   : > { %4213 = vmatpush3.msra.mxu0 %v3570_v35  ;;  %4238 = vmatpush3.msra.mxu1 %v3584_v36  ;;  %v3616_v35 = vld [vmem:[%s5961_s6 + $0xe8] sm:$0xff]  ;;  %v3601_v36 = vld [vmem:[%s5960_s5 + $0xe0] sm:$0xff] }
 0x12e   : > { %4214 = vmatprep.subr.mxu0 %v3569_v37  ;;  %4239 = vmatprep.subr.mxu1 %v3583_v38 }
 0x12f   : > { %4215 = vmatpush3.msra.mxu0 %v3569_v37  ;;  %4240 = vmatpush3.msra.mxu1 %v3583_v38  ;;  %v3615_v37 = vld [vmem:[%s5961_s6 + $0xe0] sm:$0xff]  ;;  %v3600_v38 = vld [vmem:[%s5960_s5 + $0xd8] sm:$0xff] }
 0x130   : > { %4216 = vmatprep.subr.mxu0 %v3568_v39  ;;  %4241 = vmatprep.subr.mxu1 %v3582_v40 }
 0x131   : > { %4217 = vmatpush3.msra.mxu0 %v3568_v39  ;;  %4242 = vmatpush3.msra.mxu1 %v3582_v40  ;;  %v3614_v39 = vld [vmem:[%s5961_s6 + $0xd8] sm:$0xff]  ;;  %v3599_v40 = vld [vmem:[%s5960_s5 + $0xd0] sm:$0xff] }
 0x132   : > { %4218 = vmatprep.subr.mxu0 %v3567_v41  ;;  %4243 = vmatprep.subr.mxu1 %v3581_v42 }
 0x133   : > { %4219 = vmatpush3.msra.mxu0 %v3567_v41  ;;  %4244 = vmatpush3.msra.mxu1 %v3581_v42  ;;  %v3613_v41 = vld [vmem:[%s5961_s6 + $0xd0] sm:$0xff]  ;;  %v3598_v42 = vld [vmem:[%s5960_s5 + $0xc8] sm:$0xff] }
 0x134   : > { %4220 = vmatprep.subr.mxu0 %v3566_v43  ;;  %4245 = vmatprep.subr.mxu1 %v3580_v44 }
 0x135   : > { %4221 = vmatpush3.msra.mxu0 %v3566_v43  ;;  %4246 = vmatpush3.msra.mxu1 %v3580_v44  ;;  %v3612_v43 = vld [vmem:[%s5961_s6 + $0xc8] sm:$0xff]  ;;  %v3597_v44 = vld [vmem:[%s5960_s5 + $0xc0] sm:$0xff] }
 0x136   : > { %4222 = vmatprep.subr.mxu0 %v3565_v45  ;;  %4247 = vmatprep.subr.mxu1 %v3579_v46 }
 0x137   : > { %4223 = vmatpush3.msra.mxu0 %v3565_v45  ;;  %4248 = vmatpush3.msra.mxu1 %v3579_v46  ;;  %v3611_v45 = vld [vmem:[%s5961_s6 + $0xc0] sm:$0xff]  ;;  %v3596_v46 = vld [vmem:[%s5960_s5 + $0xb8] sm:$0xff] }
 0x138   : > { %4224 = vmatprep.subr.mxu0 %v3564_v47  ;;  %4249 = vmatprep.subr.mxu1 %v3578_v48 }
 0x139   : > { %4225 = vmatpush3.msra.mxu0 %v3564_v47  ;;  %4250 = vmatpush3.msra.mxu1 %v3578_v48  ;;  %v3610_v47 = vld [vmem:[%s5961_s6 + $0xb8] sm:$0xff]  ;;  %v3595_v48 = vld [vmem:[%s5960_s5 + $0xb0] sm:$0xff] }
 0x13a   : > { %4226 = vmatprep.subr.mxu0 %v3563_v49  ;;  %4251 = vmatprep.subr.mxu1 %v3577_v50 }
 0x13b   : > { %4227 = vmatpush3.msra.mxu0 %v3563_v49  ;;  %4252 = vmatpush3.msra.mxu1 %v3577_v50  ;;  %v3609_v49 = vld [vmem:[%s5961_s6 + $0xb0] sm:$0xff] }
 0x13c   : > { %4228 = vmatprep.subr.mxu0 %v3562_v51  ;;  %4253 = vmatprep.subr.mxu1 %v3576_v52 }
 0x13d   : > { %4229 = vmatpush3.msra.mxu0 %v3562_v51  ;;  %4254 = vmatpush3.msra.mxu1 %v3576_v52  ;;  %v3633_v51 = vld [vmem:[%s5960_s5 + $0x158] sm:$0xf] }
 0x13e   : > { %4230 = vmatprep.subr.mxu0 %v3561_v53  ;;  %4255 = vmatprep.subr.mxu1 %v3575_v54  ;;  %v3647_v52 = vld [vmem:[%s5961_s6 + $0x158] sm:$0xf] }
 0x13f   : > { %4231 = vmatpush3.msra.mxu0 %v3561_v53  ;;  %4256 = vmatpush3.msra.mxu1 %v3575_v54 }
 0x140   : > { %4260 = vmatprep.subr.msk.mxu0 %vm1296_vm4, %v1697_v55  ;;  %4285 = vmatprep.subr.msk.mxu1 %vm1296_vm4, %v1708_v56 }
 0x1e9   : > { %v4198_v57 = vpop.f32.mrf.mxu0  ;;  %v4209_v58 = vpop.f32.mrf.mxu1 }
 0x1ea   : > { %v5226_v59 = vmax.f32 %v4198_v57, %v4209_v58  ;;  %v3631_v57 = vld [vmem:[%s5960_s5 + $0x148] sm:$0xff] }
 0x1eb   : > { %v1592_v60 = vpop.f32.mrf.mxu0  ;;  %v1676_v61 = vpop.f32.mrf.mxu1  ;;  %v3645_v58 = vld [vmem:[%s5961_s6 + $0x148] sm:$0xff] }
 0x1ec   : > { %v5228_v62 = vmax.f32 %v1592_v60, %v1676_v61  ;;  %v1724_v0 = vrot.slane %v5226_v59, 1  ;;  %v5234_v2 = vrot.slane %v5226_v59, 4  ;;  %v5319_v28 = vrot.slane %v5226_v59, 2  ;;  %v3644_v60 = vld [vmem:[%s5961_s6 + $0x140] sm:$0xff]  ;;  %v3629_v61 = vld [vmem:[%s5960_s5 + $0x138] sm:$0xff] }
 0x1ed   : > { %v5401_v53 = vrot.slane %v5226_v59, 3 }
 0x1ee   : > { %v1723_v63 = vrot.slane %v5228_v62, 1  ;;  %v2453_v1 = vrot.slane %v5228_v62, 4  ;;  %v2071_v25 = vrot.slane %v5228_v62, 2  ;;  %v2262_v50 = vrot.slane %v5228_v62, 3 }
 0x1f0   : > { %v1725_v3 = vsel %vm513_vm1, %v1723_v63, %v1724_v0  ;;  %v5239_v4 = vsel %vm1296_vm4, %v2453_v1, %v5234_v2  ;;  %v2073_v29 = vsel %vm888_vm2, %v2071_v25, %v5319_v28  ;;  %v2264_v54 = vsel %vm1092_vm3, %v2262_v50, %v5401_v53  ;;  %v3628_v63 = vld [vmem:[%s5960_s5 + $0x130] sm:$0xff]  ;;  %v3627_v1 = vld [vmem:[%s5960_s5 + $0x128] sm:$0xff]  ;;  %v3669_v25 = vld [vmem:[%s5961_s6 + $0x180] sm:$0xff] }
 0x1f1   : > { %4232 = vmatprep.mubr.msk.f32.mxu0 %vm1726_vm6, %v1725_v3  ;;  %4257 = vmatprep.mubr.msk.f32.mxu1 %vm1726_vm6, %v1725_v3  ;;  %v3641_v3 = vld [vmem:[%s5961_s6 + $0x128] sm:$0xff] }
 0x1f2   : > { %4233 = vmatmul.mubr.msk.f32.vlgmr.msra.gmra.mxu0 %vm1726_vm6, %v1724_v0  ;;  %4258 = vmatmul.mubr.msk.f32.vlgmr.msra.gmra.mxu1 %vm1726_vm6, %v1724_v0  ;;  %v3642_v0 = vld [vmem:[%s5961_s6 + $0x130] sm:$0xff] }
 0x1f3   : > { %4261 = vmatpush3.msk.msra.mxu0 %vm1296_vm4, %v1697_v55  ;;  %4286 = vmatpush3.msk.msra.mxu1 %vm1296_vm4, %v1708_v56  ;;  %v3632_v55 = vld [vmem:[%s5960_s5 + $0x150] sm:$0xff] }
 0x1f4   : > { %4262 = vmatprep.subr.mxu0 %v1696_v5  ;;  %4282 = vmatprep.mubr.msk.f32.mxu0 %vm1726_vm6, %v5228_v62  ;;  %v3646_v56 = vld [vmem:[%s5961_s6 + $0x150] sm:$0xff] }
 0x1f5   : > { %4287 = vmatprep.subr.mxu1 %v1707_v6  ;;  %4307 = vmatprep.mubr.msk.f32.mxu1 %vm1726_vm6, %v5228_v62  ;;  %v3643_v62 = vld [vmem:[%s5961_s6 + $0x138] sm:$0xff] }
 0x1f6   : > { %4263 = vmatpush3.msra.mxu0 %v1696_v5  ;;  %4288 = vmatpush3.msra.mxu1 %v1707_v6  ;;  %v3626_v5 = vld [vmem:[%s5960_s5 + $0x120] sm:$0xff] }
 0x1f7   : > { %4264 = vmatprep.subr.mxu0 %v1695_v7  ;;  %4289 = vmatprep.subr.mxu1 %v1706_v8  ;;  %v3640_v6 = vld [vmem:[%s5961_s6 + $0x120] sm:$0xff] }
 0x1f8   : > { %4265 = vmatpush3.msra.mxu0 %v1695_v7  ;;  %4290 = vmatpush3.msra.mxu1 %v1706_v8  ;;  %v3625_v7 = vld [vmem:[%s5960_s5 + $0x118] sm:$0xff] }
 0x1f9   : > { %4266 = vmatprep.subr.mxu0 %v1694_v9  ;;  %4291 = vmatprep.subr.mxu1 %v1705_v10  ;;  %v3639_v8 = vld [vmem:[%s5961_s6 + $0x118] sm:$0xff] }
 0x1fa   : > { %4267 = vmatpush3.msra.mxu0 %v1694_v9  ;;  %4292 = vmatpush3.msra.mxu1 %v1705_v10  ;;  %v3624_v9 = vld [vmem:[%s5960_s5 + $0x110] sm:$0xff] }
 0x1fb   : > { %4268 = vmatprep.subr.mxu0 %v1693_v11  ;;  %4293 = vmatprep.subr.mxu1 %v1704_v12  ;;  %v3638_v10 = vld [vmem:[%s5961_s6 + $0x110] sm:$0xff] }
 0x1fc   : > { %4269 = vmatpush3.msra.mxu0 %v1693_v11  ;;  %4294 = vmatpush3.msra.mxu1 %v1704_v12  ;;  %v3623_v11 = vld [vmem:[%s5960_s5 + $0x108] sm:$0xff] }
 0x1fd   : > { %4270 = vmatprep.subr.mxu0 %v1692_v13  ;;  %4295 = vmatprep.subr.mxu1 %v1703_v14  ;;  %v3637_v12 = vld [vmem:[%s5961_s6 + $0x108] sm:$0xff] }
 0x1fe   : > { %4271 = vmatpush3.msra.mxu0 %v1692_v13  ;;  %4296 = vmatpush3.msra.mxu1 %v1703_v14  ;;  %v3661_v13 = vld [vmem:[%s5960_s5 + $0x1b0] sm:$0xf] }
 0x1ff   : > { %4272 = vmatprep.subr.mxu0 %v1691_v15  ;;  %4297 = vmatprep.subr.mxu1 %v1702_v16  ;;  %v3675_v14 = vld [vmem:[%s5961_s6 + $0x1b0] sm:$0xf] }
 0x200   : > { %4273 = vmatpush3.msra.mxu0 %v1691_v15  ;;  %4298 = vmatpush3.msra.mxu1 %v1702_v16  ;;  %v3660_v15 = vld [vmem:[%s5960_s5 + $0x1a8] sm:$0xff] }
 0x201   : > { %4274 = vmatprep.subr.mxu0 %v1690_v17  ;;  %4299 = vmatprep.subr.mxu1 %v1701_v18  ;;  %v3674_v16 = vld [vmem:[%s5961_s6 + $0x1a8] sm:$0xff] }
 0x202   : > { %4275 = vmatpush3.msra.mxu0 %v1690_v17  ;;  %4300 = vmatpush3.msra.mxu1 %v1701_v18  ;;  %v3659_v17 = vld [vmem:[%s5960_s5 + $0x1a0] sm:$0xff] }
 0x203   : > { %4276 = vmatprep.subr.mxu0 %v1689_v19  ;;  %4301 = vmatprep.subr.mxu1 %v1700_v20  ;;  %v3673_v18 = vld [vmem:[%s5961_s6 + $0x1a0] sm:$0xff] }
 0x204   : > { %4277 = vmatpush3.msra.mxu0 %v1689_v19  ;;  %4302 = vmatpush3.msra.mxu1 %v1700_v20  ;;  %v3658_v19 = vld [vmem:[%s5960_s5 + $0x198] sm:$0xff]  ;;  %v3657_v20 = vld [vmem:[%s5960_s5 + $0x190] sm:$0xff] }
 0x205   : > { %4278 = vmatprep.subr.mxu0 %v1688_v21  ;;  %4303 = vmatprep.subr.mxu1 %v1699_v22 }
 0x206   : > { %4279 = vmatpush3.msra.mxu0 %v1688_v21  ;;  %4304 = vmatpush3.msra.mxu1 %v1699_v22  ;;  %v3671_v21 = vld [vmem:[%s5961_s6 + $0x190] sm:$0xff]  ;;  %v3656_v22 = vld [vmem:[%s5960_s5 + $0x188] sm:$0xff] }
 0x207   : > { %4280 = vmatprep.subr.mxu0 %v1687_v23  ;;  %4305 = vmatprep.subr.mxu1 %v1698_v24 }
 0x208   : > { %4281 = vmatpush3.msra.mxu0 %v1687_v23  ;;  %4306 = vmatpush3.msra.mxu1 %v1698_v24  ;;  %v3670_v23 = vld [vmem:[%s5961_s6 + $0x188] sm:$0xff]  ;;  %v3655_v24 = vld [vmem:[%s5960_s5 + $0x180] sm:$0xff] }
 0x209   : > { %4283 = vmatmul.mubr.msk.f32.vlgmr.msra.gmra.mxu0 %vm1726_vm6, %v5226_v59  ;;  %4308 = vmatmul.mubr.msk.f32.vlgmr.msra.gmra.mxu1 %vm1726_vm6, %v5226_v59  ;;  %v3630_v59 = vld [vmem:[%s5960_s5 + $0x140] sm:$0xff] }
 0x20a   : > { %4310 = vmatprep.subr.msk.mxu0 %vm1296_vm4, %v3605_v26  ;;  %4335 = vmatprep.subr.msk.mxu1 %vm1296_vm4, %v3619_v27 }
 0x20b   : > { %4311 = vmatpush3.msk.msra.mxu0 %vm1296_vm4, %v3605_v26  ;;  %4332 = vmatprep.mubr.msk.f32.mxu0 %vm1726_vm6, %v2073_v29  ;;  %v3654_v26 = vld [vmem:[%s5960_s5 + $0x178] sm:$0xff] }
 0x20c   : > { %4336 = vmatpush3.msk.msra.mxu1 %vm1296_vm4, %v3619_v27  ;;  %4357 = vmatprep.mubr.msk.f32.mxu1 %vm1726_vm6, %v2073_v29  ;;  %v3668_v27 = vld [vmem:[%s5961_s6 + $0x178] sm:$0xff]  ;;  %v3667_v29 = vld [vmem:[%s5961_s6 + $0x170] sm:$0xff] }
 0x20d   : > { %4312 = vmatprep.subr.mxu0 %v3604_v30  ;;  %4337 = vmatprep.subr.mxu1 %v3618_v31 }
 0x20e   : > { %4313 = vmatpush3.msra.mxu0 %v3604_v30  ;;  %4338 = vmatpush3.msra.mxu1 %v3618_v31  ;;  %v3652_v30 = vld [vmem:[%s5960_s5 + $0x168] sm:$0xff] }
 0x20f   : > { %4314 = vmatprep.subr.mxu0 %v3603_v32  ;;  %4339 = vmatprep.subr.mxu1 %v3617_v33  ;;  %v3666_v31 = vld [vmem:[%s5961_s6 + $0x168] sm:$0xff] }
 0x210   : > { %4315 = vmatpush3.msra.mxu0 %v3603_v32  ;;  %4340 = vmatpush3.msra.mxu1 %v3617_v33  ;;  %v3651_v32 = vld [vmem:[%s5960_s5 + $0x160] sm:$0xff] }
 0x211   : > { %4316 = vmatprep.subr.mxu0 %v3602_v34  ;;  %4341 = vmatprep.subr.mxu1 %v3616_v35  ;;  %v3665_v33 = vld [vmem:[%s5961_s6 + $0x160] sm:$0xff] }
 0x212   : > { %4317 = vmatpush3.msra.mxu0 %v3602_v34  ;;  %4342 = vmatpush3.msra.mxu1 %v3616_v35  ;;  %v4750_v34 = vmov 0.0  }
 0x213   : > { %4318 = vmatprep.subr.mxu0 %v3601_v36  ;;  %4343 = vmatprep.subr.mxu1 %v3615_v37 }
 0x214   : > { %4319 = vmatpush3.msra.mxu0 %v3601_v36  ;;  %4344 = vmatpush3.msra.mxu1 %v3615_v37 }
 0x215   : > { %4320 = vmatprep.subr.mxu0 %v3600_v38  ;;  %4345 = vmatprep.subr.mxu1 %v3614_v39 }
 0x216   : > { %4321 = vmatpush3.msra.mxu0 %v3600_v38  ;;  %4346 = vmatpush3.msra.mxu1 %v3614_v39 }
 0x217   : > { %4322 = vmatprep.subr.mxu0 %v3599_v40  ;;  %4347 = vmatprep.subr.mxu1 %v3613_v41 }
 0x218   : > { %4323 = vmatpush3.msra.mxu0 %v3599_v40  ;;  %4348 = vmatpush3.msra.mxu1 %v3613_v41 }
 0x219   : > { %4324 = vmatprep.subr.mxu0 %v3598_v42  ;;  %4349 = vmatprep.subr.mxu1 %v3612_v43 }
 0x21a   : > { %4325 = vmatpush3.msra.mxu0 %v3598_v42  ;;  %4350 = vmatpush3.msra.mxu1 %v3612_v43 }
 0x21b   : > { %4326 = vmatprep.subr.mxu0 %v3597_v44  ;;  %4351 = vmatprep.subr.mxu1 %v3611_v45 }
 0x21c   : > { %4327 = vmatpush3.msra.mxu0 %v3597_v44  ;;  %4352 = vmatpush3.msra.mxu1 %v3611_v45 }
 0x21d   : > { %4328 = vmatprep.subr.mxu0 %v3596_v46  ;;  %4353 = vmatprep.subr.mxu1 %v3610_v47 }
 0x21e   : > { %4329 = vmatpush3.msra.mxu0 %v3596_v46  ;;  %4354 = vmatpush3.msra.mxu1 %v3610_v47 }
 0x21f   : > { %4330 = vmatprep.subr.mxu0 %v3595_v48  ;;  %4355 = vmatprep.subr.mxu1 %v3609_v49 }
 0x220   : > { %4331 = vmatpush3.msra.mxu0 %v3595_v48  ;;  %4356 = vmatpush3.msra.mxu1 %v3609_v49 }
 0x221   : > { %4333 = vmatmul.mubr.msk.f32.vlgmr.msra.gmra.mxu0 %vm1726_vm6, %v5319_v28  ;;  %4358 = vmatmul.mubr.msk.f32.vlgmr.msra.gmra.mxu1 %vm1726_vm6, %v5319_v28  ;;  %v3653_v28 = vld [vmem:[%s5960_s5 + $0x170] sm:$0xff] }
 0x222   : > { %4360 = vmatprep.subr.msk.mxu0 %vm1296_vm4, %v3633_v51  ;;  %4385 = vmatprep.subr.msk.mxu1 %vm1296_vm4, %v3647_v52 }
 0x223   : > { %4361 = vmatpush3.msk.msra.mxu0 %vm1296_vm4, %v3633_v51  ;;  %4382 = vmatprep.mubr.msk.f32.mxu0 %vm1726_vm6, %v2264_v54 }
 0x224   : > { %4386 = vmatpush3.msk.msra.mxu1 %vm1296_vm4, %v3647_v52  ;;  %4407 = vmatprep.mubr.msk.f32.mxu1 %vm1726_vm6, %v2264_v54 }
 0x225   : > { %4362 = vmatprep.subr.mxu0 %v3632_v55  ;;  %4387 = vmatprep.subr.mxu1 %v3646_v56 }
 0x226   : > { %4363 = vmatpush3.msra.mxu0 %v3632_v55  ;;  %4388 = vmatpush3.msra.mxu1 %v3646_v56 }
 0x227   : > { %4364 = vmatprep.subr.mxu0 %v3631_v57  ;;  %4389 = vmatprep.subr.mxu1 %v3645_v58 }
 0x228   : > { %4365 = vmatpush3.msra.mxu0 %v3631_v57  ;;  %4390 = vmatpush3.msra.mxu1 %v3645_v58 }
 0x229   : > { %4366 = vmatprep.subr.mxu0 %v3630_v59  ;;  %4391 = vmatprep.subr.mxu1 %v3644_v60 }
 0x22a   : > { %4367 = vmatpush3.msra.mxu0 %v3630_v59  ;;  %4392 = vmatpush3.msra.mxu1 %v3644_v60 }
 0x22b   : > { %4368 = vmatprep.subr.mxu0 %v3629_v61  ;;  %4393 = vmatprep.subr.mxu1 %v3643_v62 }
 0x22c   : > { %4369 = vmatpush3.msra.mxu0 %v3629_v61  ;;  %4394 = vmatpush3.msra.mxu1 %v3643_v62 }
 0x22d   : > { %4370 = vmatprep.subr.mxu0 %v3628_v63  ;;  %4395 = vmatprep.subr.mxu1 %v3642_v0 }
 0x22e   : > { %4371 = vmatpush3.msra.mxu0 %v3628_v63  ;;  %4396 = vmatpush3.msra.mxu1 %v3642_v0 }
 0x22f   : > { %4372 = vmatprep.subr.mxu0 %v3627_v1  ;;  %4397 = vmatprep.subr.mxu1 %v3641_v3 }
 0x230   : > { %4373 = vmatpush3.msra.mxu0 %v3627_v1  ;;  %4398 = vmatpush3.msra.mxu1 %v3641_v3  ;;  %v3679_v3 = vld [vmem:[%s5962_s7] ss:$0 sm:$0xff] }
 0x231   : > { %4374 = vmatprep.subr.mxu0 %v3626_v5  ;;  %4399 = vmatprep.subr.mxu1 %v3640_v6 }
 0x232   : > { %4375 = vmatpush3.msra.mxu0 %v3626_v5  ;;  %4400 = vmatpush3.msra.mxu1 %v3640_v6 }
 0x233   : > { %4376 = vmatprep.subr.mxu0 %v3625_v7  ;;  %4401 = vmatprep.subr.mxu1 %v3639_v8 }
 0x234   : > { %4377 = vmatpush3.msra.mxu0 %v3625_v7  ;;  %4402 = vmatpush3.msra.mxu1 %v3639_v8 }
 0x235   : > { %4378 = vmatprep.subr.mxu0 %v3624_v9  ;;  %4403 = vmatprep.subr.mxu1 %v3638_v10 }
 0x236   : > { %4379 = vmatpush3.msra.mxu0 %v3624_v9  ;;  %4404 = vmatpush3.msra.mxu1 %v3638_v10 }
 0x237   : > { %4380 = vmatprep.subr.mxu0 %v3623_v11  ;;  %4405 = vmatprep.subr.mxu1 %v3637_v12 }
 0x238   : > { %4381 = vmatpush3.msra.mxu0 %v3623_v11  ;;  %4406 = vmatpush3.msra.mxu1 %v3637_v12 }
 0x239   : > { %4383 = vmatmul.mubr.msk.f32.vlgmr.msra.gmra.mxu0 %vm1726_vm6, %v5401_v53  ;;  %4408 = vmatmul.mubr.msk.f32.vlgmr.msra.gmra.mxu1 %vm1726_vm6, %v5401_v53 }
 0x23a   : > { %4410 = vmatprep.subr.msk.mxu0 %vm1296_vm4, %v3661_v13  ;;  %4435 = vmatprep.subr.msk.mxu1 %vm1296_vm4, %v3675_v14 }
 0x23b   : > { %4411 = vmatpush3.msk.msra.mxu0 %vm1296_vm4, %v3661_v13  ;;  %4432 = vmatprep.mubr.msk.f32.mxu0 %vm1726_vm6, %v5239_v4 }
 0x23c   : > { %4436 = vmatpush3.msk.msra.mxu1 %vm1296_vm4, %v3675_v14  ;;  %4457 = vmatprep.mubr.msk.f32.mxu1 %vm1726_vm6, %v5239_v4  ;;  %v3672_v4 = vld [vmem:[%s5961_s6 + $0x198] sm:$0xff] }
 0x23d   : > { %4412 = vmatprep.subr.mxu0 %v3660_v15  ;;  %4437 = vmatprep.subr.mxu1 %v3674_v16 }
 0x23e   : > { %4413 = vmatpush3.msra.mxu0 %v3660_v15  ;;  %4438 = vmatpush3.msra.mxu1 %v3674_v16  ;;  %v2645_v15 = vld [vmem:[%s5963_s8] sm:$0x1f]  ;;  %v3682_v16 = vld [vmem:[%s5963_s8 + $0x8] sm:$0x1f] }
 0x23f   : > { %4414 = vmatprep.subr.mxu0 %v3659_v17  ;;  %4439 = vmatprep.subr.mxu1 %v3673_v18 }
 0x240   : > { %4415 = vmatpush3.msra.mxu0 %v3659_v17  ;;  %4440 = vmatpush3.msra.mxu1 %v3673_v18  ;;  %v2809_v17 = vld [vmem:[%s5964_s9 + $0x48] sm:$0xff]  ;;  %v3694_v18 = vld [vmem:[%s5964_s9 + $0x98] sm:$0xff] }
 0x241   : > { %4416 = vmatprep.subr.mxu0 %v3658_v19  ;;  %4441 = vmatprep.subr.mxu1 %v3672_v4 }
 0x242   : > { %4417 = vmatpush3.msra.mxu0 %v3658_v19  ;;  %4442 = vmatpush3.msra.mxu1 %v3672_v4  ;;  %v2808_v19 = vld [vmem:[%s5964_s9 + $0x40] sm:$0xff]  ;;  %v3693_v4 = vld [vmem:[%s5964_s9 + $0x90] sm:$0xff] }
 0x243   : > { %4418 = vmatprep.subr.mxu0 %v3657_v20  ;;  %4443 = vmatprep.subr.mxu1 %v3671_v21 }
 0x244   : > { %4419 = vmatpush3.msra.mxu0 %v3657_v20  ;;  %4444 = vmatpush3.msra.mxu1 %v3671_v21  ;;  %v2807_v20 = vld [vmem:[%s5964_s9 + $0x38] sm:$0xff]  ;;  %v3692_v21 = vld [vmem:[%s5964_s9 + $0x88] sm:$0xff] }
 0x245   : > { %4420 = vmatprep.subr.mxu0 %v3656_v22  ;;  %4445 = vmatprep.subr.mxu1 %v3670_v23 }
 0x246   : > { %4421 = vmatpush3.msra.mxu0 %v3656_v22  ;;  %4446 = vmatpush3.msra.mxu1 %v3670_v23  ;;  %v2806_v22 = vld [vmem:[%s5964_s9 + $0x30] sm:$0xff]  ;;  %v3691_v23 = vld [vmem:[%s5964_s9 + $0x80] sm:$0xff] }
 0x247   : > { %4422 = vmatprep.subr.mxu0 %v3655_v24  ;;  %4447 = vmatprep.subr.mxu1 %v3669_v25 }
 0x248   : > { %4423 = vmatpush3.msra.mxu0 %v3655_v24  ;;  %4448 = vmatpush3.msra.mxu1 %v3669_v25  ;;  %v2805_v24 = vld [vmem:[%s5964_s9 + $0x28] sm:$0xff]  ;;  %v3690_v25 = vld [vmem:[%s5964_s9 + $0x78] sm:$0xff] }
 0x249   : > { %4424 = vmatprep.subr.mxu0 %v3654_v26  ;;  %4449 = vmatprep.subr.mxu1 %v3668_v27 }
 0x24a   : > { %4425 = vmatpush3.msra.mxu0 %v3654_v26  ;;  %4450 = vmatpush3.msra.mxu1 %v3668_v27  ;;  %v2804_v26 = vld [vmem:[%s5964_s9 + $0x20] sm:$0xff]  ;;  %v3689_v27 = vld [vmem:[%s5964_s9 + $0x70] sm:$0xff] }
 0x24b   : > { %4426 = vmatprep.subr.mxu0 %v3653_v28  ;;  %4451 = vmatprep.subr.mxu1 %v3667_v29 }
 0x24c   : > { %4427 = vmatpush3.msra.mxu0 %v3653_v28  ;;  %4452 = vmatpush3.msra.mxu1 %v3667_v29  ;;  %v2803_v28 = vld [vmem:[%s5964_s9 + $0x18] sm:$0xff]  ;;  %v3688_v29 = vld [vmem:[%s5964_s9 + $0x68] sm:$0xff] }
 0x24d   : > { %4428 = vmatprep.subr.mxu0 %v3652_v30  ;;  %4453 = vmatprep.subr.mxu1 %v3666_v31 }
 0x24e   : > { %4429 = vmatpush3.msra.mxu0 %v3652_v30  ;;  %4454 = vmatpush3.msra.mxu1 %v3666_v31  ;;  %v2802_v30 = vld [vmem:[%s5964_s9 + $0x10] sm:$0xff]  ;;  %v3687_v31 = vld [vmem:[%s5964_s9 + $0x60] sm:$0xff] }
 0x24f   : > { %4430 = vmatprep.subr.mxu0 %v3651_v32  ;;  %4455 = vmatprep.subr.mxu1 %v3665_v33 }
 0x250   : > { %4431 = vmatpush3.msra.mxu0 %v3651_v32  ;;  %4456 = vmatpush3.msra.mxu1 %v3665_v33  ;;  %v2801_v32 = vld [vmem:[%s5964_s9 + $0x8] sm:$0xff]  ;;  %v3686_v33 = vld [vmem:[%s5964_s9 + $0x58] sm:$0xff] }
 0x251   : > { %4433 = vmatmul.mubr.msk.f32.vlgmr.msra.gmra.mxu0 %vm1726_vm6, %v5234_v2  ;;  %4458 = vmatmul.mubr.msk.f32.vlgmr.msra.gmra.mxu1 %vm1726_vm6, %v5234_v2 }
 0x252   : > { %4460 = vmatprep.subr.mxu0 %v4750_v34  ;;  %4467 = vmatprep.subr.mxu1 %v4750_v34 }
 0x253   : > { %4464 = vmatprep.mubr.msk.f32.mxu0 %vm4751_vm7, %v4750_v34  ;;  %4471 = vmatprep.mubr.msk.f32.mxu1 %vm4751_vm7, %v4750_v34 }
 0x2b2   : > { %v4234_v35 = vpop.f32.mrf.mxu0  ;;  %v4259_v36 = vpop.f32.mrf.mxu1 }
 0x2b4   : > { %v1800_v37 = vpop.f32.mrf.mxu0  ;;  %v1890_v38 = vpop.f32.mrf.mxu1 }
 0x2c9   : > { %v4284_v39 = vpop.f32.mrf.mxu0  ;;  %v4309_v40 = vpop.f32.mrf.mxu1 }
 0x2ca   : > { %v1978_v48 = vadd.f32 %v4284_v39, %v4234_v35  ;;  %v2056_v49 = vadd.f32 %v4309_v40, %v4259_v36  ;;  %v2800_v35 = vld [vmem:[%s5964_s9] sm:$0xff]  ;;  %v3685_v36 = vld [vmem:[%s5964_s9 + $0x50] sm:$0xff]  ;;  %v3717_v40 = vld [vmem:[%s5964_s9 + $0x138] sm:$0xff] }
 0x2cb   : > { %v1972_v41 = vpop.f32.mrf.mxu0  ;;  %v2050_v2 = vpop.f32.mrf.mxu1 }
 0x2cc   : > { %v1973_v50 = vadd.f32 %v1972_v41, %v1800_v37  ;;  %v2051_v51 = vadd.f32 %v2050_v2, %v1890_v38 }
 0x2e1   : > { %v4334_v42 = vpop.f32.mrf.mxu0  ;;  %v4359_v43 = vpop.f32.mrf.mxu1 }
 0x2e2   : > { %v2247_v52 = vadd.f32 %v4334_v42, %v1978_v48  ;;  %v2249_v53 = vadd.f32 %v4359_v43, %v2056_v49  ;;  %v3706_v43 = vld [vmem:[%s5964_s9 + $0xe8] sm:$0xff]  ;;  %v3714_v48 = vld [vmem:[%s5964_s9 + $0x120] sm:$0xff]  ;;  %v3703_v49 = vld [vmem:[%s5964_s9 + $0xd0] sm:$0xff] }
 0x2e3   : > { %v2147_v44 = vpop.f32.mrf.mxu0  ;;  %v2237_v45 = vpop.f32.mrf.mxu1 }
 0x2e4   : > { %v2246_v56 = vadd.f32 %v2147_v44, %v1973_v50  ;;  %v2248_v57 = vadd.f32 %v2237_v45, %v2051_v51  ;;  %v3716_v44 = vld [vmem:[%s5964_s9 + $0x130] sm:$0xff]  ;;  %v3705_v45 = vld [vmem:[%s5964_s9 + $0xe0] sm:$0xff]  ;;  %v3713_v50 = vld [vmem:[%s5964_s9 + $0x118] sm:$0xff] }
 0x2e5   : > { %v3702_v51 = vld [vmem:[%s5964_s9 + $0xc8] sm:$0xff] }
 0x2f9   : > { %v4384_v46 = vpop.f32.mrf.mxu0  ;;  %v4409_v47 = vpop.f32.mrf.mxu1 }
 0x2fa   : > { %v2438_v58 = vadd.f32 %v4384_v46, %v2247_v52  ;;  %v2440_v59 = vadd.f32 %v4409_v47, %v2249_v53  ;;  %v3715_v46 = vld [vmem:[%s5964_s9 + $0x128] sm:$0xff]  ;;  %v3704_v47 = vld [vmem:[%s5964_s9 + $0xd8] sm:$0xff]  ;;  %v3712_v52 = vld [vmem:[%s5964_s9 + $0x110] sm:$0xff] }
 0x2fb   : > { %v2338_v54 = vpop.f32.mrf.mxu0  ;;  %v2428_v55 = vpop.f32.mrf.mxu1  ;;  %v3701_v53 = vld [vmem:[%s5964_s9 + $0xc0] sm:$0xff] }
 0x2fc   : > { %v2437_v62 = vadd.f32 %v2338_v54, %v2246_v56  ;;  %v2439_v63 = vadd.f32 %v2428_v55, %v2248_v57  ;;  %v3711_v54 = vld [vmem:[%s5964_s9 + $0x108] sm:$0xff]  ;;  %v3700_v55 = vld [vmem:[%s5964_s9 + $0xb8] sm:$0xff]  ;;  %v3710_v56 = vld [vmem:[%s5964_s9 + $0x100] sm:$0xff] }
 0x2fd   : > { %v3699_v57 = vld [vmem:[%s5964_s9 + $0xb0] sm:$0xff] }
 0x311   : > { %v4434_v60 = vpop.f32.mrf.mxu0  ;;  %v4459_v61 = vpop.f32.mrf.mxu1 }
 0x312   : > { %v2629_v0 = vadd.f32 %v4434_v60, %v2438_v58  ;;  %v2631_v1 = vadd.f32 %v4459_v61, %v2440_v59  ;;  %v3709_v58 = vld [vmem:[%s5964_s9 + $0xf8] sm:$0xff]  ;;  %v3698_v59 = vld [vmem:[%s5964_s9 + $0xa8] sm:$0xff]  ;;  %v3708_v60 = vld [vmem:[%s5964_s9 + $0xf0] sm:$0xff] }
 0x313   : > { %v2529_v5 = vpop.f32.mrf.mxu0  ;;  %v2619_v6 = vpop.f32.mrf.mxu1 }
 0x314   : > { %v2633_v7 = vmax.f32 %v2629_v0, %v2631_v1  ;;  %v2628_v8 = vadd.f32 %v2529_v5, %v2437_v62  ;;  %v2630_v9 = vadd.f32 %v2619_v6, %v2439_v63  ;;  %v3697_v62 = vld [vmem:[%s5964_s9 + $0xa0] sm:$0xff]  ;;  %v3728_v0 = vld [vmem:[%s5964_s9 + $0x188] sm:$0xff]  ;;  %v3725_v5 = vld [vmem:[%s5964_s9 + $0x170] sm:$0xff] }
 0x315   : > { %v3727_v1 = vld [vmem:[%s5964_s9 + $0x180] sm:$0xff]  ;;  %v3724_v6 = vld [vmem:[%s5964_s9 + $0x168] sm:$0xff] }
 0x316   : > { %v2642_v10 = vadd.f32 %v3679_v3, %v2633_v7  ;;  %v2632_v11 = vmax.f32 %v2628_v8, %v2630_v9  ;;  %v3723_v7 = vld [vmem:[%s5964_s9 + $0x160] sm:$0xff]  ;;  %v3722_v8 = vld [vmem:[%s5964_s9 + $0x158] sm:$0xff]  ;;  %v3721_v9 = vld [vmem:[%s5964_s9 + $0x150] sm:$0xff] }
 0x318   : > { %v2644_v12 = vmax.f32 %v2642_v10, 0.0  ;;  %v2641_v13 = vadd.f32 %v3679_v3, %v2632_v11  ;;  %v3726_v3 = vld [vmem:[%s5964_s9 + $0x178] sm:$0xff]  ;;  %v3720_v10 = vld [vmem:[%s5964_s9 + $0x148] sm:$0xff]  ;;  %v3719_v11 = vld [vmem:[%s5964_s9 + $0x140] sm:$0xff] }
 0x31a   : > { %v2643_v14 = vmax.f32 %v2641_v13, 0.0  ;;  %4461 = vmatpush3.msk.msra.mxu0 %vm2650_vm8, %v2644_v12  ;;  %4468 = vmatpush3.msk.msra.mxu1 %vm2650_vm8, %v2644_v12  ;;  %v3240_v13 = vld [vmem:[%s5966_s11 + $0x70] sm:$0xff] }
 0x31b   : > { %4462 = vmatprep.subr.mxu0 %v4750_v34  ;;  %4469 = vmatprep.subr.mxu1 %v4750_v34 }
 0x31c   : > { %4463 = vmatpush3.msra.mxu0 %v2643_v14  ;;  %4470 = vmatpush3.msra.mxu1 %v2643_v14  ;;  %v3239_v14 = vld [vmem:[%s5966_s11 + $0x68] sm:$0xff] }
 0x31d   : > { %4465 = vmatmul.mubr.msk.f32.vlgmr.msra.gmra.mxu0 %vm2646_vm9, %v2645_v15  ;;  %4472 = vmatmul.mubr.msk.f32.vlgmr.msra.gmra.mxu1 %vm2646_vm9, %v3682_v16  ;;  %v3238_v15 = vld [vmem:[%s5966_s11 + $0x60] sm:$0xff]  ;;  %v3237_v16 = vld [vmem:[%s5966_s11 + $0x58] sm:$0xff] }
 0x31e   : > { %4497 = vmatprep.subr.mxu1 %v4750_v34  ;;  %4474 = vmatprep.subr.mxu0 %v4750_v34 }
 0x31f   : > { %4498 = vmatpush3.msra.mxu1 %v2809_v17  ;;  %4475 = vmatpush3.msra.mxu0 %v3694_v18  ;;  %v3236_v17 = vld [vmem:[%s5966_s11 + $0x50] sm:$0xff]  ;;  %v3235_v18 = vld [vmem:[%s5966_s11 + $0x48] sm:$0xff] }
 0x320   : > { %4499 = vmatprep.subr.mxu1 %v4750_v34  ;;  %4476 = vmatprep.subr.mxu0 %v4750_v34 }
 0x321   : > { %4500 = vmatpush3.msra.mxu1 %v2808_v19  ;;  %4477 = vmatpush3.msra.mxu0 %v3693_v4  ;;  %v3234_v19 = vld [vmem:[%s5966_s11 + $0x40] sm:$0xff]  ;;  %v3233_v4 = vld [vmem:[%s5966_s11 + $0x38] sm:$0xff] }
 0x322   : > { %4501 = vmatprep.subr.mxu1 %v4750_v34  ;;  %4478 = vmatprep.subr.mxu0 %v4750_v34 }
 0x323   : > { %4502 = vmatpush3.msra.mxu1 %v2807_v20  ;;  %4479 = vmatpush3.msra.mxu0 %v3692_v21  ;;  %v3232_v20 = vld [vmem:[%s5966_s11 + $0x30] sm:$0xff]  ;;  %v3231_v21 = vld [vmem:[%s5966_s11 + $0x28] sm:$0xff] }
 0x324   : > { %4503 = vmatprep.subr.mxu1 %v4750_v34  ;;  %4480 = vmatprep.subr.mxu0 %v4750_v34 }
 0x325   : > { %4504 = vmatpush3.msra.mxu1 %v2806_v22  ;;  %4481 = vmatpush3.msra.mxu0 %v3691_v23  ;;  %v3230_v22 = vld [vmem:[%s5966_s11 + $0x20] sm:$0xff]  ;;  %v3229_v23 = vld [vmem:[%s5966_s11 + $0x18] sm:$0xff] }
 0x326   : > { %4505 = vmatprep.subr.mxu1 %v4750_v34  ;;  %4482 = vmatprep.subr.mxu0 %v4750_v34 }
 0x327   : > { %4506 = vmatpush3.msra.mxu1 %v2805_v24  ;;  %4483 = vmatpush3.msra.mxu0 %v3690_v25  ;;  %v3228_v24 = vld [vmem:[%s5966_s11 + $0x10] sm:$0xff]  ;;  %v3227_v25 = vld [vmem:[%s5966_s11 + $0x8] sm:$0xff] }
 0x328   : > { %4507 = vmatprep.subr.mxu1 %v4750_v34  ;;  %4484 = vmatprep.subr.mxu0 %v4750_v34 }
 0x329   : > { %4508 = vmatpush3.msra.mxu1 %v2804_v26  ;;  %4485 = vmatpush3.msra.mxu0 %v3689_v27  ;;  %v3226_v26 = vld [vmem:[%s5966_s11] sm:$0xff]  ;;  %v3327_v27 = vld [vmem:[%s5968_s13 + $0x50] sm:$0xf] }
 0x32a   : > { %4509 = vmatprep.subr.mxu1 %v4750_v34  ;;  %4486 = vmatprep.subr.mxu0 %v4750_v34 }
 0x32b   : > { %4510 = vmatpush3.msra.mxu1 %v2803_v28  ;;  %4487 = vmatpush3.msra.mxu0 %v3688_v29  ;;  %v3326_v28 = vld [vmem:[%s5968_s13 + $0x48] sm:$0xff]  ;;  %v3325_v29 = vld [vmem:[%s5968_s13 + $0x40] sm:$0xff] }
 0x32c   : > { %4511 = vmatprep.subr.mxu1 %v4750_v34  ;;  %4488 = vmatprep.subr.mxu0 %v4750_v34 }
 0x32d   : > { %4512 = vmatpush3.msra.mxu1 %v2802_v30  ;;  %4489 = vmatpush3.msra.mxu0 %v3687_v31  ;;  %v3324_v30 = vld [vmem:[%s5968_s13 + $0x38] sm:$0xff]  ;;  %v3323_v31 = vld [vmem:[%s5968_s13 + $0x30] sm:$0xff] }
 0x32e   : > { %4513 = vmatprep.subr.mxu1 %v4750_v34  ;;  %4490 = vmatprep.subr.mxu0 %v4750_v34 }
 0x32f   : > { %4514 = vmatpush3.msra.mxu1 %v2801_v32  ;;  %4517 = vmatprep.mubr.msk.f32.mxu1 %vm4751_vm7, %v4750_v34  ;;  %v3322_v32 = vld [vmem:[%s5968_s13 + $0x28] sm:$0xff] }
 0x330   : > { %4515 = vmatprep.subr.mxu1 %v4750_v34  ;;  %4494 = vmatprep.mubr.msk.f32.mxu0 %vm4751_vm7, %v4750_v34 }
 0x331   : > { %4491 = vmatpush3.msra.mxu0 %v3686_v33  ;;  %4516 = vmatpush3.msra.mxu1 %v2800_v35  ;;  %v3321_v33 = vld [vmem:[%s5968_s13 + $0x20] sm:$0xff]  ;;  %v3320_v35 = vld [vmem:[%s5968_s13 + $0x18] sm:$0xff] }
 0x332   : > { %4492 = vmatprep.subr.mxu0 %v4750_v34  ;;  %4543 = vmatprep.subr.mxu1 %v4750_v34 }
 0x333   : > { %4493 = vmatpush3.msra.mxu0 %v3685_v36 }
 0x334   : > { %4520 = vmatprep.subr.mxu0 %v4750_v34 }
 0x3dd   : > { %v2720_v37 = vpop.f32.mrf.mxu0  ;;  %v2795_v38 = vpop.f32.mrf.mxu1 }
 0x3de   : > { %v5660_v39 = vmax.f32 %v2720_v37, %v2795_v38 }
 0x3df   : > { %v4466_v41 = vpop.f32.mrf.mxu0  ;;  %v4473_v2 = vpop.f32.mrf.mxu1 }
 0x3e0   : > { %4518 = vmatmul.mubr.msk.f32.vlgmr.msra.gmra.mxu1 %vm2823_vm10, %v5660_v39  ;;  %v2822_v42 = vrot.slane %v5660_v39, 1  ;;  %v3064_v61 = vrot.slane %v5660_v39, 3  ;;  %v2979_v63 = vrot.slane %v5660_v39, 2  ;;  %v3149_v12 = vrot.slane %v5660_v39, 4 }
 0x3e1   : > { %4544 = vmatpush3.msra.mxu1 %v3717_v40  ;;  %4563 = vmatprep.mubr.msk.f32.mxu1 %vm4751_vm7, %v4750_v34 }
 0x3e2   : > { %4545 = vmatprep.subr.mxu1 %v4750_v34  ;;  %4495 = vmatmul.mubr.msk.f32.vlgmr.msra.gmra.mxu0 %vm2823_vm10, %v2822_v42 }
 0x3e3   : > { %4521 = vmatpush3.msra.mxu0 %v3706_v43  ;;  %4546 = vmatpush3.msra.mxu1 %v3716_v44 }
 0x3e4   : > { %4522 = vmatprep.subr.mxu0 %v4750_v34  ;;  %4547 = vmatprep.subr.mxu1 %v4750_v34 }
 0x3e5   : > { %4523 = vmatpush3.msra.mxu0 %v3705_v45  ;;  %4548 = vmatpush3.msra.mxu1 %v3715_v46 }
 0x3e6   : > { %4524 = vmatprep.subr.mxu0 %v4750_v34  ;;  %4549 = vmatprep.subr.mxu1 %v4750_v34 }
 0x3e7   : > { %4525 = vmatpush3.msra.mxu0 %v3704_v47  ;;  %4550 = vmatpush3.msra.mxu1 %v3714_v48  ;;  %v3223_v47 = vld [vmem:[%s5965_s10] sm:$0x1] }
 0x3e8   : > { %4526 = vmatprep.subr.mxu0 %v4750_v34  ;;  %4551 = vmatprep.subr.mxu1 %v4750_v34 }
 0x3e9   : > { %4527 = vmatpush3.msra.mxu0 %v3703_v49  ;;  %4552 = vmatpush3.msra.mxu1 %v3713_v50 }
 0x3ea   : > { %4528 = vmatprep.subr.mxu0 %v4750_v34  ;;  %4553 = vmatprep.subr.mxu1 %v4750_v34 }
 0x3eb   : > { %4529 = vmatpush3.msra.mxu0 %v3702_v51  ;;  %4554 = vmatpush3.msra.mxu1 %v3712_v52  ;;  %v3319_v52 = vld [vmem:[%s5968_s13 + $0x10] sm:$0xff] }
 0x3ec   : > { %4530 = vmatprep.subr.mxu0 %v4750_v34  ;;  %4555 = vmatprep.subr.mxu1 %v4750_v34 }
 0x3ed   : > { %4531 = vmatpush3.msra.mxu0 %v3701_v53  ;;  %4556 = vmatpush3.msra.mxu1 %v3711_v54  ;;  %v3318_v53 = vld [vmem:[%s5968_s13 + $0x8] sm:$0xff]  ;;  %v3317_v54 = vld [vmem:[%s5968_s13] sm:$0xff] }
 0x3ee   : > { %4532 = vmatprep.subr.mxu0 %v4750_v34  ;;  %4557 = vmatprep.subr.mxu1 %v4750_v34 }
 0x3ef   : > { %4533 = vmatpush3.msra.mxu0 %v3700_v55  ;;  %4558 = vmatpush3.msra.mxu1 %v3710_v56  ;;  %v3241_v55 = vld [vmem:[%s5967_s12] sm:$0x1] }
 0x3f0   : > { %4534 = vmatprep.subr.mxu0 %v4750_v34  ;;  %4559 = vmatprep.subr.mxu1 %v4750_v34 }
 0x3f1   : > { %4535 = vmatpush3.msra.mxu0 %v3699_v57  ;;  %4560 = vmatpush3.msra.mxu1 %v3709_v58 }
 0x3f2   : > { %4536 = vmatprep.subr.mxu0 %v4750_v34  ;;  %4561 = vmatprep.subr.mxu1 %v4750_v34 }
 0x3f3   : > { %4537 = vmatpush3.msra.mxu0 %v3698_v59  ;;  %4562 = vmatpush3.msra.mxu1 %v3708_v60 }
 0x3f4   : > { %4538 = vmatprep.subr.mxu0 %v4750_v34  ;;  %4564 = vmatmul.mubr.msk.f32.vlgmr.msra.gmra.mxu1 %vm2823_vm10, %v3064_v61 }
 0x3f5   : > { %4539 = vmatpush3.msra.mxu0 %v3697_v62  ;;  %4540 = vmatprep.mubr.msk.f32.mxu0 %vm4751_vm7, %v4750_v34 }
 0x3f6   : > { %4541 = vmatmul.mubr.msk.f32.vlgmr.msra.gmra.mxu0 %vm2823_vm10, %v2979_v63  ;;  %4566 = vmatprep.subr.mxu0 %v4750_v34 }
 0x3f7   : > { %4567 = vmatpush3.msra.mxu0 %v3728_v0  ;;  %4586 = vmatprep.mubr.msk.f32.mxu0 %vm4751_vm7, %v4750_v34 }
 0x3f8   : > { %4568 = vmatprep.subr.mxu0 %v4750_v34  ;;  %4589 = vmatprep.subr.mxu1 %v4750_v34 }
 0x3f9   : > { %4569 = vmatpush3.msra.mxu0 %v3727_v1  ;;  %4619 = vmatprep.mubr.msk.f32.mxu1 %vm4751_vm7, %v4750_v34 }
 0x3fa   : > { %4570 = vmatprep.subr.mxu0 %v4750_v34  ;;  %4590 = vmatpush3.msra.mxu1 %v3240_v13 }
 0x3fb   : > { %4571 = vmatpush3.msra.mxu0 %v3726_v3  ;;  %4591 = vmatprep.subr.mxu1 %v4750_v34 }
 0x3fc   : > { %4572 = vmatprep.subr.mxu0 %v4750_v34  ;;  %4592 = vmatpush3.msra.mxu1 %v3239_v14 }
 0x3fd   : > { %4573 = vmatpush3.msra.mxu0 %v3725_v5  ;;  %4593 = vmatprep.subr.mxu1 %v4750_v34 }
 0x3fe   : > { %4574 = vmatprep.subr.mxu0 %v4750_v34  ;;  %4594 = vmatpush3.msra.mxu1 %v3238_v15 }
 0x3ff   : > { %4575 = vmatpush3.msra.mxu0 %v3724_v6  ;;  %4595 = vmatprep.subr.mxu1 %v4750_v34 }
 0x400   : > { %4576 = vmatprep.subr.mxu0 %v4750_v34  ;;  %4596 = vmatpush3.msra.mxu1 %v3237_v16 }
 0x401   : > { %4577 = vmatpush3.msra.mxu0 %v3723_v7  ;;  %4597 = vmatprep.subr.mxu1 %v4750_v34 }
 0x402   : > { %4578 = vmatprep.subr.mxu0 %v4750_v34  ;;  %4598 = vmatpush3.msra.mxu1 %v3236_v17 }
 0x403   : > { %4579 = vmatpush3.msra.mxu0 %v3722_v8  ;;  %4599 = vmatprep.subr.mxu1 %v4750_v34 }
 0x404   : > { %4580 = vmatprep.subr.mxu0 %v4750_v34  ;;  %4600 = vmatpush3.msra.mxu1 %v3235_v18 }
 0x405   : > { %4581 = vmatpush3.msra.mxu0 %v3721_v9  ;;  %4601 = vmatprep.subr.mxu1 %v4750_v34 }
 0x406   : > { %4582 = vmatprep.subr.mxu0 %v4750_v34  ;;  %4602 = vmatpush3.msra.mxu1 %v3234_v19 }
 0x407   : > { %4583 = vmatpush3.msra.mxu0 %v3720_v10  ;;  %4603 = vmatprep.subr.mxu1 %v4750_v34 }
 0x408   : > { %4584 = vmatprep.subr.mxu0 %v4750_v34  ;;  %4604 = vmatpush3.msra.mxu1 %v3233_v4 }
 0x409   : > { %4585 = vmatpush3.msra.mxu0 %v3719_v11  ;;  %4605 = vmatprep.subr.mxu1 %v4750_v34 }
 0x40a   : > { %4587 = vmatmul.mubr.msk.f32.vlgmr.msra.gmra.mxu0 %vm2823_vm10, %v3149_v12  ;;  %4622 = vmatprep.subr.mxu0 %v4750_v34 }
 0x40b   : > { %4644 = vmatprep.mubr.msk.f32.mxu0 %vm4751_vm7, %v4750_v34  ;;  %4606 = vmatpush3.msra.mxu1 %v3232_v20 }
 0x40c   : > { %4607 = vmatprep.subr.mxu1 %v4750_v34  ;;  %4623 = vmatpush3.msk.msra.mxu0 %vm1296_vm4, %v3327_v27 }
 0x40d   : > { %4608 = vmatpush3.msra.mxu1 %v3231_v21  ;;  %4624 = vmatprep.subr.mxu0 %v4750_v34 }
 0x40e   : > { %4609 = vmatprep.subr.mxu1 %v4750_v34  ;;  %4625 = vmatpush3.msra.mxu0 %v3326_v28 }
 0x40f   : > { %4610 = vmatpush3.msra.mxu1 %v3230_v22  ;;  %4626 = vmatprep.subr.mxu0 %v4750_v34 }
 0x410   : > { %4611 = vmatprep.subr.mxu1 %v4750_v34  ;;  %4627 = vmatpush3.msra.mxu0 %v3325_v29 }
 0x411   : > { %4612 = vmatpush3.msra.mxu1 %v3229_v23  ;;  %4628 = vmatprep.subr.mxu0 %v4750_v34 }
 0x412   : > { %4613 = vmatprep.subr.mxu1 %v4750_v34  ;;  %4629 = vmatpush3.msra.mxu0 %v3324_v30 }
 0x413   : > { %4614 = vmatpush3.msra.mxu1 %v3228_v24  ;;  %4630 = vmatprep.subr.mxu0 %v4750_v34 }
 0x414   : > { %4615 = vmatprep.subr.mxu1 %v4750_v34  ;;  %4631 = vmatpush3.msra.mxu0 %v3323_v31 }
 0x415   : > { %4616 = vmatpush3.msra.mxu1 %v3227_v25  ;;  %4632 = vmatprep.subr.mxu0 %v4750_v34 }
 0x416   : > { %4617 = vmatprep.subr.mxu1 %v4750_v34  ;;  %4633 = vmatpush3.msra.mxu0 %v3322_v32 }
 0x417   : > { %4618 = vmatpush3.msra.mxu1 %v3226_v26  ;;  %4634 = vmatprep.subr.mxu0 %v4750_v34 }
 0x418   : > { %4635 = vmatpush3.msra.mxu0 %v3321_v33 }
 0x419   : > { %4636 = vmatprep.subr.mxu0 %v4750_v34 }
 0x41a   : > { %4637 = vmatpush3.msra.mxu0 %v3320_v35 }
 0x41b   : > { %4638 = vmatprep.subr.mxu0 %v4750_v34 }
 0x41c   : > { %4639 = vmatpush3.msra.mxu0 %v3319_v52 }
 0x41d   : > { %4640 = vmatprep.subr.mxu0 %v4750_v34 }
 0x41e   : > { %4641 = vmatpush3.msra.mxu0 %v3318_v53 }
 0x41f   : > { %4642 = vmatprep.subr.mxu0 %v4750_v34  ;;  %v3328_v34 = vld [vmem:[%s5969_s14] sm:$0x1] }
 0x420   : > { %4643 = vmatpush3.msra.mxu0 %v3317_v54 }
 0x4a0   : > { %v2964_v36 = vpop.f32.mrf.mxu1 }
 0x4a2   : > { %v2892_v37 = vpop.f32.mrf.mxu0  ;;  %v4519_v38 = vpop.f32.mrf.mxu1 }
 0x4a3   : > { %v2965_v43 = vadd.f32 %v2964_v36, %v2892_v37 }
 0x4a4   : > { %v4496_v39 = vpop.f32.mrf.mxu0 }
 0x4b4   : > { %v3133_v40 = vpop.f32.mrf.mxu1 }
 0x4b6   : > { %v3048_v41 = vpop.f32.mrf.mxu0  ;;  %v4565_v2 = vpop.f32.mrf.mxu1 }
 0x4b7   : > { %v3052_v44 = vadd.f32 %v3048_v41, %v2965_v43 }
 0x4b8   : > { %v4542_v42 = vpop.f32.mrf.mxu0 }
 0x4b9   : > { %v3137_v45 = vadd.f32 %v3133_v40, %v3052_v44 }
 0x4ca   : > { %v3218_v46 = vpop.f32.mrf.mxu0 }
 0x4cb   : > { %v3222_v48 = vadd.f32 %v3218_v46, %v3137_v45 }
 0x4cc   : > { %v4588_v49 = vpop.f32.mrf.mxu0 }
 0x4cd   : > { %v3224_v50 = vadd.f32 %v3223_v47, %v3222_v48 }
 0x4cf   : > { %v3225_v51 = vmax.f32 %v3224_v50, 0.0 }
 0x4d1   : > { %4620 = vmatmul.mubr.msk.f32.vlgmr.msra.gmra.mxu1 %vm3242_vm11, %v3225_v51 }
 0x591   : > { %v3312_v56 = vpop.f32.mrf.mxu1 }
 0x592   : > { %v3313_v57 = vadd.f32 %v3312_v56, %v3241_v55 }
 0x593   : > { %v4621_v58 = vpop.f32.mrf.mxu1 }
 0x594   : > { %v3316_v59 = vmax.f32 %v3313_v57, 0.0 }
 0x596   : > { %4645 = vmatmul.mubr.msk.f32.vlgmr.msra.gmra.mxu0 %vm1726_vm6, %v3316_v59 }
 0x656   : > { %v3401_v60 = vpop.f32.mrf.mxu0 }
 0x657   : > { %v3402_v61 = vadd.f32 %v3401_v60, %v3328_v34 }
 0x658   : > { %v4646_v62 = vpop.f32.mrf.mxu0 }
 0x659   : > { %3405 = vst [vmem:[%s486_s30] sm:$0x1] %v3402_v61 }
 0x65a   : > { %4701 = shalt.err (!%p4698_p3)
}
 0x65b   : > { %s4702_s27 = scalar_lea.hbm %s5920_s18, 16  ;;  %s4706_s24 = scalar_lea.hbm %s5970_s15, 32 }
 0x65c   : > { %p4703_p4 = scmp.ne.s32.totalorder %s5920_s18, %s4702_s27  ;;  %p4707_p9 = scmp.lt.s32.totalorder %s5920_s18, %s5970_s15 }
 0x65d   : > { %p4708_p10 = scmp.lt.s32.totalorder %s4706_s24, %s4702_s27 }
 0x65e   : > { %p4704_p7 = pnand %p4703_p4, %p4871_p5 }
 0x65f   : > { %p4709_p11 = por %p4708_p10, %p4707_p9 }
 0x660   : > { %p4705_p8 = pneg %p4704_p7 }
 0x662   : > { %p4710_p12 = pnand %p4709_p11, %p4705_p8 }
 0x664   : > { %4713 = shalt.err (!%p4710_p12)
}
 0x665   : > { %4647 = dma.vmem_to_hbm [thread:$0]  (%p4871_p5), %s3420_s16, 16, %s5920_s18, %s3407_s29  }
 0x666 PF: > { %s5983_s23 = sld [smem:[#allocation5_spill]]  ;;  %p4653_p13 = scmp.ge.s32.totalorder %s4748_s21, 2 }
 0x668   : > { %p4650_p0 = pnand %p4653_p13, %p4875_p6 }
 0x66a   : > { %p4651_p1 = pneg %p4650_p0 }
 0x66c   : > { %s3431_s20 = sand.u32 1, %s5983_s23  }
 0x66d   : > { %s3432_s25 = scalar_lea.sflag [#allocation3], %s3431_s20 }
 0x66e   : > { %4731 = dma.done.wait (%p4651_p1), %s3432_s25, 16  }
 0x66f   : > { %4733 = vsyncadd (%p4651_p1), %s3432_s25, 4294967280  ;;  %s5985_s21 = sld [smem:[#allocation7_spill]]  ;;  %s5988_s18 = smov %s4740_s19 }
 0x670   : > { %s5986_s27 = sld [smem:[#allocation6_spill]] }
 0x671   : > { %s5987_s20 = sld [smem:[#allocation8_spill]] }
 0x675   : > { %p25_p2 = scmp.ge.s32.totalorder %s5985_s21, 4  }
 0x676   : > { %s5989_s19 = smov %s5986_s27 }
 0x677   :  { %27 = sbr.rel (!%p25_p2) target bundleno = 3 (0x3), region = 137 }
 0x67c   :  { %3436 = vsyncpa [#allocation3], 1 }
 0x67d   :  { %3438 = vsyncpa [#allocation3 + $0x1], 1 }

</bundles_post_ra>
